<compile_context>
chip_gen: v7x
topology: tpu7x:2x2x1
jax: 0.10.0
libtpu: 0.0.40
codegen_flags: <defaults>
</compile_context>

<pallas_src>
import numpy as np
import jax
import jax.numpy as jnp
from jax import lax
from jax.experimental import pallas as pl
from jax.experimental.pallas import tpu as pltpu

LANE = 128
ROW_TILE = 16   # bf16 sublane tile (16 rows); segment starts/gaps are multiples of this


def _round_up(x, m):
    return ((x + m - 1) // m) * m


# ----------------------------------------------------------------------------
# Pallas kernel: whole VQDecoderV5 forward, all batch rows stacked into M
# ----------------------------------------------------------------------------
def make_vqdecoder_kernel(n_resblk, n_up, B, T, seg, c_in, cpad):
    M = B * seg          # stacked rows: each batch segment = T real rows + zero gap rows
    bf16 = jnp.bfloat16

    def kernel(x_ref, w_ref, b_ref, out_ref, act_ref, res_ref):
        # x_ref  : (B, T, c_in)   f32, unpadded input (padding happens inside the kernel)
        # w_ref  : (n_conv, 3*cpad, cpad) bf16 folded conv weights (K = 3*cpad)
        # b_ref  : (n_conv, 1, cpad)      f32 biases
        # out_ref: (B, T, cpad)   f32 padded output (lane-dense store)
        # act_ref: (M, cpad) bf16 stacked activation slab (gap rows = zero conv halo)
        # res_ref: (M, cpad) bf16 residual slab (skip connection kept in VMEM, not vregs)

        # Zero the slab ONCE per call (single grid step): provides the zero gap rows
        # between batch segments and the zero-padded channel columns.
        act_ref[...] = jnp.zeros_like(act_ref)
        for b in range(B):
            act_ref[b * seg:b * seg + T, :c_in] = x_ref[b].astype(bf16)

        def conv(ci):
            # "same" 3-tap Conv1d along time as ONE (M, 3*cpad) @ (3*cpad, cpad) bf16 matmul.
            x = act_ref[...]                      # aligned (M, cpad) bf16 load
            x32 = x.astype(jnp.float32)           # roll in f32 (avoid packed-dtype sublane roll)
            # Gap rows are zero, so a whole-stack roll gives the correct per-segment zero halo
            # (wrap-around lands on / comes from gap rows).
            xp = pltpu.roll(x32, 1, 0).astype(bf16)       # x[t-1]
            xn = pltpu.roll(x32, M - 1, 0).astype(bf16)   # x[t+1]
            lhs = jnp.concatenate([xp, x, xn], axis=-1)   # (M, 3*cpad) im2col LHS
            y = jnp.dot(lhs, w_ref[ci], preferred_element_type=jnp.float32)
            return y + b_ref[ci]                  # f32 (M, cpad); bias in the f32 epilogue

        def leaky(y):
            return jnp.maximum(y, 0.2 * y)        # mul+max instead of cmp+mul+select

        def store_act(y):
            # Store only the real rows of each segment -> gap rows stay zero forever.
            yb = y.astype(bf16)
            for b in range(B):
                act_ref[b * seg:b * seg + T, :] = yb[b * seg:b * seg + T, :]

        ci = 0
        # --- n_resblk x ResBlock: conv3 -> LeakyReLU(0.2) -> conv3, additive skip
        for _ in range(n_resblk):
            res_ref[...] = act_ref[...]           # skip kept in VMEM
            store_act(leaky(conv(ci))); ci += 1
            y = conv(ci); ci += 1
            store_act(y + res_ref[...].astype(jnp.float32))
        # --- n_up x (conv3 -> LeakyReLU(0.2))   (no Upsample in the reference module)
        for _ in range(n_up):
            store_act(leaky(conv(ci))); ci += 1
        # --- final conv3, written lane-dense to the padded f32 output
        y = conv(ci)
        for b in range(B):
            out_ref[b] = y[b * seg:b * seg + T, :]

    return kernel


# ----------------------------------------------------------------------------
# pallas_call wrapper
# ----------------------------------------------------------------------------
def vq_decoder_forward(params, inputs):
    """inputs: (B, T, vae_length) -> (B, T, vae_test_dim), eval-mode forward."""
    B, T, C_in = inputs.shape
    cpad = params["cpad"]
    # Segment = T real rows (rounded to the bf16 row tile) + 16 zero gap rows (conv halo).
    seg = _round_up(T, ROW_TILE) + ROW_TILE
    M = B * seg

    kernel = make_vqdecoder_kernel(params["n_resblk"], params["n_up"],
                                   B, T, seg, C_in, cpad)
    out = pl.pallas_call(
        kernel,
        out_shape=jax.ShapeDtypeStruct((B, T, cpad), jnp.float32),
        grid_spec=pltpu.PrefetchScalarGridSpec(
            num_scalar_prefetch=0,
            grid=(1,),  # whole batch stacked into one MXU M dimension (single step)
            in_specs=[
                pl.BlockSpec((B, T, C_in), lambda i: (0, 0, 0)),
                pl.BlockSpec(params["w_all"].shape, lambda i: (0, 0, 0)),
                pl.BlockSpec(params["b_all"].shape, lambda i: (0, 0, 0)),
            ],
            out_specs=pl.BlockSpec((B, T, cpad), lambda i: (0, 0, 0)),
            scratch_shapes=[pltpu.VMEM((M, cpad), jnp.bfloat16),   # activation slab
                            pltpu.VMEM((M, cpad), jnp.bfloat16)],  # residual slab
        ),
        compiler_params=pltpu.CompilerParams(dimension_semantics=("arbitrary",)),
    )(inputs.astype(jnp.float32), params["w_all"], params["b_all"])
    return out[:, :, :params["out_dim"]]


# ----------------------------------------------------------------------------
# Deterministic synthetic parameters (canonical weights are the bf16-rounded values)
# ----------------------------------------------------------------------------
def init_params(key, vae_length, vae_test_dim, vae_layer, n_resblk=2):
    n_up = vae_layer
    channels = [vae_length] * (n_up - 1) + [vae_length, vae_test_dim]
    assert len(channels) == n_up + 1
    assert vae_length == channels[0]  # VQDecoderV5 never adds the optional first conv

    conv_dims = []
    for _ in range(n_resblk):
        conv_dims += [(channels[0], channels[0]), (channels[0], channels[0])]
    for i in range(n_up):
        conv_dims.append((channels[i], channels[i + 1]))
    conv_dims.append((channels[-1], channels[-1]))

    cmax = max(max(d) for d in conv_dims)
    cpad = int(pl.cdiv(cmax, LANE)) * LANE
    n_conv = len(conv_dims)

    # Folded layout: w_all[ci, k*cpad + cin_idx, cout_idx] = torch_weight[cout, cin, k]
    w_all = np.zeros((n_conv, 3 * cpad, cpad), np.float32)
    b_all = np.zeros((n_conv, 1, cpad), np.float32)
    ref_convs = []
    for idx, (cin, cout) in enumerate(conv_dims):
        key, kw, kb = jax.random.split(key, 3)
        bound = 1.0 / np.sqrt(3 * cin)
        w = jax.random.uniform(kw, (3, cin, cout), jnp.float32, -bound, bound)
        b = jax.random.uniform(kb, (1, cout), jnp.float32, -bound, bound)
        # Canonical parameters are the bf16-rounded weights (exactly what the MXU consumes).
        w = w.astype(jnp.bfloat16).astype(jnp.float32)
        ref_convs.append((w, b))
        wn = np.asarray(w)
        for k in range(3):
            w_all[idx, k * cpad:k * cpad + cin, :cout] = wn[k]
        b_all[idx, 0, :cout] = np.asarray(b)[0]

    return dict(w_all=jnp.asarray(w_all, jnp.bfloat16),
                b_all=jnp.asarray(b_all, jnp.float32),
                ref_convs=ref_convs, cpad=cpad,
                n_resblk=n_resblk, n_up=n_up, out_dim=vae_test_dim)


# ----------------------------------------------------------------------------
# Pure-JAX f32 reference for a correctness check
# ----------------------------------------------------------------------------
def reference_forward(params, inputs):
    hi = lax.Precision.HIGHEST

    def conv3(h, w, b):
        hp = jnp.pad(h, ((0, 0), (1, 1), (0, 0)))
        return (jnp.einsum("btc,cd->btd", hp[:, :-2], w[0], precision=hi)
                + jnp.einsum("btc,cd->btd", hp[:, 1:-1], w[1], precision=hi)
                + jnp.einsum("btc,cd->btd", hp[:, 2:], w[2], precision=hi)
                + b)

    def leaky(y):
        return jnp.maximum(y, 0.2 * y)

    convs = params["ref_convs"]
    h = inputs.astype(jnp.float32)
    ci = 0
    for _ in range(params["n_resblk"]):
        r = h
        h = leaky(conv3(h, *convs[ci])); ci += 1
        h = conv3(h, *convs[ci]); ci += 1
        h = r + h
    for _ in range(params["n_up"]):
        h = leaky(conv3(h, *convs[ci])); ci += 1
    return conv3(h, *convs[ci])


# ----------------------------------------------------------------------------
if __name__ == "__main__":
    # Small config consistent with the module:
    #   args.vae_layer = 2, args.vae_length = 128, args.vae_test_dim = 64
    batch, seq = 2, 16
    vae_layer, vae_length, vae_test_dim = 2, 128, 64

    key = jax.random.PRNGKey(0)
    key, pkey, xkey = jax.random.split(key, 3)
    params = init_params(pkey, vae_length, vae_test_dim, vae_layer)
    inputs = jax.random.normal(xkey, (batch, seq, vae_length), jnp.float32)

    out = jax.block_until_ready(vq_decoder_forward(params, inputs))
    assert out.shape == (batch, seq, vae_test_dim), out.shape
    assert bool(jnp.all(jnp.isfinite(out)))

    ref = jax.block_until_ready(reference_forward(params, inputs))
    # bf16 activations / matmul inputs (f32 accumulation) -> looser tolerance than pure f32.
    np.testing.assert_allclose(np.asarray(out), np.asarray(ref), rtol=5e-2, atol=5e-2)

    print("KERNEL_OK")
</pallas_src>

<mosaic_0001>
module attributes {stable_mosaic.version = 11 : i64} {
  func.func @kernel(%arg0: i32, %arg1: memref<2x16x128xf32, #tpu.memory_space<vmem>>, %arg2: memref<7x384x128xbf16, #tpu.memory_space<vmem>>, %arg3: memref<7x1x128xf32, #tpu.memory_space<vmem>>, %arg4: memref<2x16x128xf32, #tpu.memory_space<vmem>>, %arg5: memref<64x128xbf16, #tpu.memory_space<vmem>>, %arg6: memref<64x128xbf16, #tpu.memory_space<vmem>>) attributes {dimension_semantics = [#tpu.dimension_semantics<arbitrary>], iteration_bounds = array<i64: 1>, scalar_prefetch = 0 : i64, scratch_operands = 2 : i64, tpu.core_type = #tpu.core_type<tc>, window_params = [{pipeline_mode = #tpu.pipeline_mode<synchronous>, transform_indices = @transform_0, window_bounds = array<i64: 2, 16, 128>}, {pipeline_mode = #tpu.pipeline_mode<synchronous>, transform_indices = @transform_1, window_bounds = array<i64: 7, 384, 128>}, {pipeline_mode = #tpu.pipeline_mode<synchronous>, transform_indices = @transform_2, window_bounds = array<i64: 7, 1, 128>}, {pipeline_mode = #tpu.pipeline_mode<synchronous>, transform_indices = @transform_3, window_bounds = array<i64: 2, 16, 128>}]} {
    %cst = arith.constant 0.000000e+00 : bf16
    %0 = vector.broadcast %cst : bf16 to vector<64x128xbf16>
    %c0 = arith.constant 0 : index
    %c0_0 = arith.constant 0 : index
    %1 = vector.load %arg5[%c0, %c0_0] : memref<64x128xbf16, #tpu.memory_space<vmem>>, vector<64x128xbf16>
    tpu.vector_store %arg5[%c0, %c0_0], %0 {strides = array<i32>} : memref<64x128xbf16, #tpu.memory_space<vmem>>, vector<64x128xbf16>,
    %c0_1 = arith.constant 0 : index
    %c0_2 = arith.constant 0 : index
    %c0_3 = arith.constant 0 : index
    %2 = vector.load %arg1[%c0_1, %c0_2, %c0_3] : memref<2x16x128xf32, #tpu.memory_space<vmem>>, vector<1x16x128xf32>
    %3 = vector.shape_cast %2 : vector<1x16x128xf32> to vector<16x128xf32>
    %4 = arith.truncf %3 : vector<16x128xf32> to vector<16x128xbf16>
    %c0_4 = arith.constant 0 : index
    %c0_5 = arith.constant 0 : index
    %5 = vector.load %arg5[%c0_4, %c0_5] : memref<64x128xbf16, #tpu.memory_space<vmem>>, vector<16x128xbf16>
    tpu.vector_store %arg5[%c0_4, %c0_5], %4 {strides = array<i32>} : memref<64x128xbf16, #tpu.memory_space<vmem>>, vector<16x128xbf16>,
    %c1 = arith.constant 1 : index
    %c0_6 = arith.constant 0 : index
    %c0_7 = arith.constant 0 : index
    %6 = vector.load %arg1[%c1, %c0_6, %c0_7] : memref<2x16x128xf32, #tpu.memory_space<vmem>>, vector<1x16x128xf32>
    %7 = vector.shape_cast %6 : vector<1x16x128xf32> to vector<16x128xf32>
    %8 = arith.truncf %7 : vector<16x128xf32> to vector<16x128xbf16>
    %c32 = arith.constant 32 : index
    %c0_8 = arith.constant 0 : index
    %9 = vector.load %arg5[%c32, %c0_8] : memref<64x128xbf16, #tpu.memory_space<vmem>>, vector<16x128xbf16>
    tpu.vector_store %arg5[%c32, %c0_8], %8 {strides = array<i32>} : memref<64x128xbf16, #tpu.memory_space<vmem>>, vector<16x128xbf16>,
    %c0_9 = arith.constant 0 : index
    %c0_10 = arith.constant 0 : index
    %10 = vector.load %arg5[%c0_9, %c0_10] : memref<64x128xbf16, #tpu.memory_space<vmem>>, vector<64x128xbf16>
    %c0_11 = arith.constant 0 : index
    %c0_12 = arith.constant 0 : index
    %11 = vector.load %arg6[%c0_11, %c0_12] : memref<64x128xbf16, #tpu.memory_space<vmem>>, vector<64x128xbf16>
    tpu.vector_store %arg6[%c0_11, %c0_12], %10 {strides = array<i32>} : memref<64x128xbf16, #tpu.memory_space<vmem>>, vector<64x128xbf16>,
    %c0_13 = arith.constant 0 : index
    %c0_14 = arith.constant 0 : index
    %12 = vector.load %arg5[%c0_13, %c0_14] : memref<64x128xbf16, #tpu.memory_space<vmem>>, vector<64x128xbf16>
    %13 = arith.extf %12 : vector<64x128xbf16> to vector<64x128xf32>
    %c1_i32 = arith.constant 1 : i32
    %14 = tpu.dynamic_rotate %13 by %c1_i32 dim 0 : vector<64x128xf32>, i32 -> vector<64x128xf32>
    %15 = arith.truncf %14 : vector<64x128xf32> to vector<64x128xbf16>
    %c63_i32 = arith.constant 63 : i32
    %16 = tpu.dynamic_rotate %13 by %c63_i32 dim 0 : vector<64x128xf32>, i32 -> vector<64x128xf32>
    %17 = arith.truncf %16 : vector<64x128xf32> to vector<64x128xbf16>
    %18 = tpu.concatenate %15, %12, %17 in 1 : vector<64x128xbf16>, vector<64x128xbf16>, vector<64x128xbf16> -> vector<64x384xbf16>
    %c0_15 = arith.constant 0 : index
    %c0_16 = arith.constant 0 : index
    %c0_17 = arith.constant 0 : index
    %19 = vector.load %arg2[%c0_15, %c0_16, %c0_17] : memref<7x384x128xbf16, #tpu.memory_space<vmem>>, vector<1x384x128xbf16>
    %20 = vector.shape_cast %19 : vector<1x384x128xbf16> to vector<384x128xbf16>
    %cst_18 = arith.constant dense<0.000000e+00> : vector<64x128xf32>
    %21 = tpu.matmul %18, %20, %cst_18 {dimension_numbers = #tpu.dot_dimension_numbers<[1], [0], [0], [1], [0, 0, 1, 1], [], []>} : vector<64x384xbf16>, vector<384x128xbf16>, vector<64x128xf32> -> vector<64x128xf32>
    %c0_19 = arith.constant 0 : index
    %c0_20 = arith.constant 0 : index
    %c0_21 = arith.constant 0 : index
    %22 = vector.load %arg3[%c0_19, %c0_20, %c0_21] : memref<7x1x128xf32, #tpu.memory_space<vmem>>, vector<1x1x128xf32>
    %23 = vector.shape_cast %22 : vector<1x1x128xf32> to vector<1x128xf32>
    %24 = vector.broadcast %23 : vector<1x128xf32> to vector<64x128xf32>
    %25 = arith.addf %21, %24 : vector<64x128xf32>
    %cst_22 = arith.constant 2.000000e-01 : f32
    %26 = vector.broadcast %cst_22 : f32 to vector<64x128xf32>
    %27 = arith.mulf %26, %25 : vector<64x128xf32>
    %28 = arith.maximumf %25, %27 : vector<64x128xf32>
    %29 = arith.truncf %28 : vector<64x128xf32> to vector<64x128xbf16>
    %30 = vector.extract_strided_slice %29 {offsets = [0, 0], sizes = [16, 128], strides = [1, 1]} : vector<64x128xbf16> to vector<16x128xbf16>
    %c0_23 = arith.constant 0 : index
    %c0_24 = arith.constant 0 : index
    %31 = vector.load %arg5[%c0_23, %c0_24] : memref<64x128xbf16, #tpu.memory_space<vmem>>, vector<16x128xbf16>
    tpu.vector_store %arg5[%c0_23, %c0_24], %30 {strides = array<i32>} : memref<64x128xbf16, #tpu.memory_space<vmem>>, vector<16x128xbf16>,
    %32 = vector.extract_strided_slice %29 {offsets = [32, 0], sizes = [16, 128], strides = [1, 1]} : vector<64x128xbf16> to vector<16x128xbf16>
    %c32_25 = arith.constant 32 : index
    %c0_26 = arith.constant 0 : index
    %33 = vector.load %arg5[%c32_25, %c0_26] : memref<64x128xbf16, #tpu.memory_space<vmem>>, vector<16x128xbf16>
    tpu.vector_store %arg5[%c32_25, %c0_26], %32 {strides = array<i32>} : memref<64x128xbf16, #tpu.memory_space<vmem>>, vector<16x128xbf16>,
    %c0_27 = arith.constant 0 : index
    %c0_28 = arith.constant 0 : index
    %34 = vector.load %arg5[%c0_27, %c0_28] : memref<64x128xbf16, #tpu.memory_space<vmem>>, vector<64x128xbf16>
    %35 = arith.extf %34 : vector<64x128xbf16> to vector<64x128xf32>
    %c1_i32_29 = arith.constant 1 : i32
    %36 = tpu.dynamic_rotate %35 by %c1_i32_29 dim 0 : vector<64x128xf32>, i32 -> vector<64x128xf32>
    %37 = arith.truncf %36 : vector<64x128xf32> to vector<64x128xbf16>
    %c63_i32_30 = arith.constant 63 : i32
    %38 = tpu.dynamic_rotate %35 by %c63_i32_30 dim 0 : vector<64x128xf32>, i32 -> vector<64x128xf32>
    %39 = arith.truncf %38 : vector<64x128xf32> to vector<64x128xbf16>
    %40 = tpu.concatenate %37, %34, %39 in 1 : vector<64x128xbf16>, vector<64x128xbf16>, vector<64x128xbf16> -> vector<64x384xbf16>
    %c1_31 = arith.constant 1 : index
    %c0_32 = arith.constant 0 : index
    %c0_33 = arith.constant 0 : index
    %41 = vector.load %arg2[%c1_31, %c0_32, %c0_33] : memref<7x384x128xbf16, #tpu.memory_space<vmem>>, vector<1x384x128xbf16>
    %42 = vector.shape_cast %41 : vector<1x384x128xbf16> to vector<384x128xbf16>
    %cst_34 = arith.constant dense<0.000000e+00> : vector<64x128xf32>
    %43 = tpu.matmul %40, %42, %cst_34 {dimension_numbers = #tpu.dot_dimension_numbers<[1], [0], [0], [1], [0, 0, 1, 1], [], []>} : vector<64x384xbf16>, vector<384x128xbf16>, vector<64x128xf32> -> vector<64x128xf32>
    %c1_35 = arith.constant 1 : index
    %c0_36 = arith.constant 0 : index
    %c0_37 = arith.constant 0 : index
    %44 = vector.load %arg3[%c1_35, %c0_36, %c0_37] : memref<7x1x128xf32, #tpu.memory_space<vmem>>, vector<1x1x128xf32>
    %45 = vector.shape_cast %44 : vector<1x1x128xf32> to vector<1x128xf32>
    %46 = vector.broadcast %45 : vector<1x128xf32> to vector<64x128xf32>
    %47 = arith.addf %43, %46 : vector<64x128xf32>
    %c0_38 = arith.constant 0 : index
    %c0_39 = arith.constant 0 : index
    %48 = vector.load %arg6[%c0_38, %c0_39] : memref<64x128xbf16, #tpu.memory_space<vmem>>, vector<64x128xbf16>
    %49 = arith.extf %48 : vector<64x128xbf16> to vector<64x128xf32>
    %50 = arith.addf %47, %49 : vector<64x128xf32>
    %51 = arith.truncf %50 : vector<64x128xf32> to vector<64x128xbf16>
    %52 = vector.extract_strided_slice %51 {offsets = [0, 0], sizes = [16, 128], strides = [1, 1]} : vector<64x128xbf16> to vector<16x128xbf16>
    %c0_40 = arith.constant 0 : index
    %c0_41 = arith.constant 0 : index
    %53 = vector.load %arg5[%c0_40, %c0_41] : memref<64x128xbf16, #tpu.memory_space<vmem>>, vector<16x128xbf16>
    tpu.vector_store %arg5[%c0_40, %c0_41], %52 {strides = array<i32>} : memref<64x128xbf16, #tpu.memory_space<vmem>>, vector<16x128xbf16>,
    %54 = vector.extract_strided_slice %51 {offsets = [32, 0], sizes = [16, 128], strides = [1, 1]} : vector<64x128xbf16> to vector<16x128xbf16>
    %c32_42 = arith.constant 32 : index
    %c0_43 = arith.constant 0 : index
    %55 = vector.load %arg5[%c32_42, %c0_43] : memref<64x128xbf16, #tpu.memory_space<vmem>>, vector<16x128xbf16>
    tpu.vector_store %arg5[%c32_42, %c0_43], %54 {strides = array<i32>} : memref<64x128xbf16, #tpu.memory_space<vmem>>, vector<16x128xbf16>,
    %c0_44 = arith.constant 0 : index
    %c0_45 = arith.constant 0 : index
    %56 = vector.load %arg5[%c0_44, %c0_45] : memref<64x128xbf16, #tpu.memory_space<vmem>>, vector<64x128xbf16>
    %c0_46 = arith.constant 0 : index
    %c0_47 = arith.constant 0 : index
    %57 = vector.load %arg6[%c0_46, %c0_47] : memref<64x128xbf16, #tpu.memory_space<vmem>>, vector<64x128xbf16>
    tpu.vector_store %arg6[%c0_46, %c0_47], %56 {strides = array<i32>} : memref<64x128xbf16, #tpu.memory_space<vmem>>, vector<64x128xbf16>,
    %c0_48 = arith.constant 0 : index
    %c0_49 = arith.constant 0 : index
    %58 = vector.load %arg5[%c0_48, %c0_49] : memref<64x128xbf16, #tpu.memory_space<vmem>>, vector<64x128xbf16>
    %59 = arith.extf %58 : vector<64x128xbf16> to vector<64x128xf32>
    %c1_i32_50 = arith.constant 1 : i32
    %60 = tpu.dynamic_rotate %59 by %c1_i32_50 dim 0 : vector<64x128xf32>, i32 -> vector<64x128xf32>
    %61 = arith.truncf %60 : vector<64x128xf32> to vector<64x128xbf16>
    %c63_i32_51 = arith.constant 63 : i32
    %62 = tpu.dynamic_rotate %59 by %c63_i32_51 dim 0 : vector<64x128xf32>, i32 -> vector<64x128xf32>
    %63 = arith.truncf %62 : vector<64x128xf32> to vector<64x128xbf16>
    %64 = tpu.concatenate %61, %58, %63 in 1 : vector<64x128xbf16>, vector<64x128xbf16>, vector<64x128xbf16> -> vector<64x384xbf16>
    %c2 = arith.constant 2 : index
    %c0_52 = arith.constant 0 : index
    %c0_53 = arith.constant 0 : index
    %65 = vector.load %arg2[%c2, %c0_52, %c0_53] : memref<7x384x128xbf16, #tpu.memory_space<vmem>>, vector<1x384x128xbf16>
    %66 = vector.shape_cast %65 : vector<1x384x128xbf16> to vector<384x128xbf16>
    %cst_54 = arith.constant dense<0.000000e+00> : vector<64x128xf32>
    %67 = tpu.matmul %64, %66, %cst_54 {dimension_numbers = #tpu.dot_dimension_numbers<[1], [0], [0], [1], [0, 0, 1, 1], [], []>} : vector<64x384xbf16>, vector<384x128xbf16>, vector<64x128xf32> -> vector<64x128xf32>
    %c2_55 = arith.constant 2 : index
    %c0_56 = arith.constant 0 : index
    %c0_57 = arith.constant 0 : index
    %68 = vector.load %arg3[%c2_55, %c0_56, %c0_57] : memref<7x1x128xf32, #tpu.memory_space<vmem>>, vector<1x1x128xf32>
    %69 = vector.shape_cast %68 : vector<1x1x128xf32> to vector<1x128xf32>
    %70 = vector.broadcast %69 : vector<1x128xf32> to vector<64x128xf32>
    %71 = arith.addf %67, %70 : vector<64x128xf32>
    %cst_58 = arith.constant 2.000000e-01 : f32
    %72 = vector.broadcast %cst_58 : f32 to vector<64x128xf32>
    %73 = arith.mulf %72, %71 : vector<64x128xf32>
    %74 = arith.maximumf %71, %73 : vector<64x128xf32>
    %75 = arith.truncf %74 : vector<64x128xf32> to vector<64x128xbf16>
    %76 = vector.extract_strided_slice %75 {offsets = [0, 0], sizes = [16, 128], strides = [1, 1]} : vector<64x128xbf16> to vector<16x128xbf16>
    %c0_59 = arith.constant 0 : index
    %c0_60 = arith.constant 0 : index
    %77 = vector.load %arg5[%c0_59, %c0_60] : memref<64x128xbf16, #tpu.memory_space<vmem>>, vector<16x128xbf16>
    tpu.vector_store %arg5[%c0_59, %c0_60], %76 {strides = array<i32>} : memref<64x128xbf16, #tpu.memory_space<vmem>>, vector<16x128xbf16>,
    %78 = vector.extract_strided_slice %75 {offsets = [32, 0], sizes = [16, 128], strides = [1, 1]} : vector<64x128xbf16> to vector<16x128xbf16>
    %c32_61 = arith.constant 32 : index
    %c0_62 = arith.constant 0 : index
    %79 = vector.load %arg5[%c32_61, %c0_62] : memref<64x128xbf16, #tpu.memory_space<vmem>>, vector<16x128xbf16>
    tpu.vector_store %arg5[%c32_61, %c0_62], %78 {strides = array<i32>} : memref<64x128xbf16, #tpu.memory_space<vmem>>, vector<16x128xbf16>,
    %c0_63 = arith.constant 0 : index
    %c0_64 = arith.constant 0 : index
    %80 = vector.load %arg5[%c0_63, %c0_64] : memref<64x128xbf16, #tpu.memory_space<vmem>>, vector<64x128xbf16>
    %81 = arith.extf %80 : vector<64x128xbf16> to vector<64x128xf32>
    %c1_i32_65 = arith.constant 1 : i32
    %82 = tpu.dynamic_rotate %81 by %c1_i32_65 dim 0 : vector<64x128xf32>, i32 -> vector<64x128xf32>
    %83 = arith.truncf %82 : vector<64x128xf32> to vector<64x128xbf16>
    %c63_i32_66 = arith.constant 63 : i32
    %84 = tpu.dynamic_rotate %81 by %c63_i32_66 dim 0 : vector<64x128xf32>, i32 -> vector<64x128xf32>
    %85 = arith.truncf %84 : vector<64x128xf32> to vector<64x128xbf16>
    %86 = tpu.concatenate %83, %80, %85 in 1 : vector<64x128xbf16>, vector<64x128xbf16>, vector<64x128xbf16> -> vector<64x384xbf16>
    %c3 = arith.constant 3 : index
    %c0_67 = arith.constant 0 : index
    %c0_68 = arith.constant 0 : index
    %87 = vector.load %arg2[%c3, %c0_67, %c0_68] : memref<7x384x128xbf16, #tpu.memory_space<vmem>>, vector<1x384x128xbf16>
    %88 = vector.shape_cast %87 : vector<1x384x128xbf16> to vector<384x128xbf16>
    %cst_69 = arith.constant dense<0.000000e+00> : vector<64x128xf32>
    %89 = tpu.matmul %86, %88, %cst_69 {dimension_numbers = #tpu.dot_dimension_numbers<[1], [0], [0], [1], [0, 0, 1, 1], [], []>} : vector<64x384xbf16>, vector<384x128xbf16>, vector<64x128xf32> -> vector<64x128xf32>
    %c3_70 = arith.constant 3 : index
    %c0_71 = arith.constant 0 : index
    %c0_72 = arith.constant 0 : index
    %90 = vector.load %arg3[%c3_70, %c0_71, %c0_72] : memref<7x1x128xf32, #tpu.memory_space<vmem>>, vector<1x1x128xf32>
    %91 = vector.shape_cast %90 : vector<1x1x128xf32> to vector<1x128xf32>
    %92 = vector.broadcast %91 : vector<1x128xf32> to vector<64x128xf32>
    %93 = arith.addf %89, %92 : vector<64x128xf32>
    %c0_73 = arith.constant 0 : index
    %c0_74 = arith.constant 0 : index
    %94 = vector.load %arg6[%c0_73, %c0_74] : memref<64x128xbf16, #tpu.memory_space<vmem>>, vector<64x128xbf16>
    %95 = arith.extf %94 : vector<64x128xbf16> to vector<64x128xf32>
    %96 = arith.addf %93, %95 : vector<64x128xf32>
    %97 = arith.truncf %96 : vector<64x128xf32> to vector<64x128xbf16>
    %98 = vector.extract_strided_slice %97 {offsets = [0, 0], sizes = [16, 128], strides = [1, 1]} : vector<64x128xbf16> to vector<16x128xbf16>
    %c0_75 = arith.constant 0 : index
    %c0_76 = arith.constant 0 : index
    %99 = vector.load %arg5[%c0_75, %c0_76] : memref<64x128xbf16, #tpu.memory_space<vmem>>, vector<16x128xbf16>
    tpu.vector_store %arg5[%c0_75, %c0_76], %98 {strides = array<i32>} : memref<64x128xbf16, #tpu.memory_space<vmem>>, vector<16x128xbf16>,
    %100 = vector.extract_strided_slice %97 {offsets = [32, 0], sizes = [16, 128], strides = [1, 1]} : vector<64x128xbf16> to vector<16x128xbf16>
    %c32_77 = arith.constant 32 : index
    %c0_78 = arith.constant 0 : index
    %101 = vector.load %arg5[%c32_77, %c0_78] : memref<64x128xbf16, #tpu.memory_space<vmem>>, vector<16x128xbf16>
    tpu.vector_store %arg5[%c32_77, %c0_78], %100 {strides = array<i32>} : memref<64x128xbf16, #tpu.memory_space<vmem>>, vector<16x128xbf16>,
    %c0_79 = arith.constant 0 : index
    %c0_80 = arith.constant 0 : index
    %102 = vector.load %arg5[%c0_79, %c0_80] : memref<64x128xbf16, #tpu.memory_space<vmem>>, vector<64x128xbf16>
    %103 = arith.extf %102 : vector<64x128xbf16> to vector<64x128xf32>
    %c1_i32_81 = arith.constant 1 : i32
    %104 = tpu.dynamic_rotate %103 by %c1_i32_81 dim 0 : vector<64x128xf32>, i32 -> vector<64x128xf32>
    %105 = arith.truncf %104 : vector<64x128xf32> to vector<64x128xbf16>
    %c63_i32_82 = arith.constant 63 : i32
    %106 = tpu.dynamic_rotate %103 by %c63_i32_82 dim 0 : vector<64x128xf32>, i32 -> vector<64x128xf32>
    %107 = arith.truncf %106 : vector<64x128xf32> to vector<64x128xbf16>
    %108 = tpu.concatenate %105, %102, %107 in 1 : vector<64x128xbf16>, vector<64x128xbf16>, vector<64x128xbf16> -> vector<64x384xbf16>
    %c4 = arith.constant 4 : index
    %c0_83 = arith.constant 0 : index
    %c0_84 = arith.constant 0 : index
    %109 = vector.load %arg2[%c4, %c0_83, %c0_84] : memref<7x384x128xbf16, #tpu.memory_space<vmem>>, vector<1x384x128xbf16>
    %110 = vector.shape_cast %109 : vector<1x384x128xbf16> to vector<384x128xbf16>
    %cst_85 = arith.constant dense<0.000000e+00> : vector<64x128xf32>
    %111 = tpu.matmul %108, %110, %cst_85 {dimension_numbers = #tpu.dot_dimension_numbers<[1], [0], [0], [1], [0, 0, 1, 1], [], []>} : vector<64x384xbf16>, vector<384x128xbf16>, vector<64x128xf32> -> vector<64x128xf32>
    %c4_86 = arith.constant 4 : index
    %c0_87 = arith.constant 0 : index
    %c0_88 = arith.constant 0 : index
    %112 = vector.load %arg3[%c4_86, %c0_87, %c0_88] : memref<7x1x128xf32, #tpu.memory_space<vmem>>, vector<1x1x128xf32>
    %113 = vector.shape_cast %112 : vector<1x1x128xf32> to vector<1x128xf32>
    %114 = vector.broadcast %113 : vector<1x128xf32> to vector<64x128xf32>
    %115 = arith.addf %111, %114 : vector<64x128xf32>
    %cst_89 = arith.constant 2.000000e-01 : f32
    %116 = vector.broadcast %cst_89 : f32 to vector<64x128xf32>
    %117 = arith.mulf %116, %115 : vector<64x128xf32>
    %118 = arith.maximumf %115, %117 : vector<64x128xf32>
    %119 = arith.truncf %118 : vector<64x128xf32> to vector<64x128xbf16>
    %120 = vector.extract_strided_slice %119 {offsets = [0, 0], sizes = [16, 128], strides = [1, 1]} : vector<64x128xbf16> to vector<16x128xbf16>
    %c0_90 = arith.constant 0 : index
    %c0_91 = arith.constant 0 : index
    %121 = vector.load %arg5[%c0_90, %c0_91] : memref<64x128xbf16, #tpu.memory_space<vmem>>, vector<16x128xbf16>
    tpu.vector_store %arg5[%c0_90, %c0_91], %120 {strides = array<i32>} : memref<64x128xbf16, #tpu.memory_space<vmem>>, vector<16x128xbf16>,
    %122 = vector.extract_strided_slice %119 {offsets = [32, 0], sizes = [16, 128], strides = [1, 1]} : vector<64x128xbf16> to vector<16x128xbf16>
    %c32_92 = arith.constant 32 : index
    %c0_93 = arith.constant 0 : index
    %123 = vector.load %arg5[%c32_92, %c0_93] : memref<64x128xbf16, #tpu.memory_space<vmem>>, vector<16x128xbf16>
    tpu.vector_store %arg5[%c32_92, %c0_93], %122 {strides = array<i32>} : memref<64x128xbf16, #tpu.memory_space<vmem>>, vector<16x128xbf16>,
    %c0_94 = arith.constant 0 : index
    %c0_95 = arith.constant 0 : index
    %124 = vector.load %arg5[%c0_94, %c0_95] : memref<64x128xbf16, #tpu.memory_space<vmem>>, vector<64x128xbf16>
    %125 = arith.extf %124 : vector<64x128xbf16> to vector<64x128xf32>
    %c1_i32_96 = arith.constant 1 : i32
    %126 = tpu.dynamic_rotate %125 by %c1_i32_96 dim 0 : vector<64x128xf32>, i32 -> vector<64x128xf32>
    %127 = arith.truncf %126 : vector<64x128xf32> to vector<64x128xbf16>
    %c63_i32_97 = arith.constant 63 : i32
    %128 = tpu.dynamic_rotate %125 by %c63_i32_97 dim 0 : vector<64x128xf32>, i32 -> vector<64x128xf32>
    %129 = arith.truncf %128 : vector<64x128xf32> to vector<64x128xbf16>
    %130 = tpu.concatenate %127, %124, %129 in 1 : vector<64x128xbf16>, vector<64x128xbf16>, vector<64x128xbf16> -> vector<64x384xbf16>
    %c5 = arith.constant 5 : index
    %c0_98 = arith.constant 0 : index
    %c0_99 = arith.constant 0 : index
    %131 = vector.load %arg2[%c5, %c0_98, %c0_99] : memref<7x384x128xbf16, #tpu.memory_space<vmem>>, vector<1x384x128xbf16>
    %132 = vector.shape_cast %131 : vector<1x384x128xbf16> to vector<384x128xbf16>
    %cst_100 = arith.constant dense<0.000000e+00> : vector<64x128xf32>
    %133 = tpu.matmul %130, %132, %cst_100 {dimension_numbers = #tpu.dot_dimension_numbers<[1], [0], [0], [1], [0, 0, 1, 1], [], []>} : vector<64x384xbf16>, vector<384x128xbf16>, vector<64x128xf32> -> vector<64x128xf32>
    %c5_101 = arith.constant 5 : index
    %c0_102 = arith.constant 0 : index
    %c0_103 = arith.constant 0 : index
    %134 = vector.load %arg3[%c5_101, %c0_102, %c0_103] : memref<7x1x128xf32, #tpu.memory_space<vmem>>, vector<1x1x128xf32>
    %135 = vector.shape_cast %134 : vector<1x1x128xf32> to vector<1x128xf32>
    %136 = vector.broadcast %135 : vector<1x128xf32> to vector<64x128xf32>
    %137 = arith.addf %133, %136 : vector<64x128xf32>
    %cst_104 = arith.constant 2.000000e-01 : f32
    %138 = vector.broadcast %cst_104 : f32 to vector<64x128xf32>
    %139 = arith.mulf %138, %137 : vector<64x128xf32>
    %140 = arith.maximumf %137, %139 : vector<64x128xf32>
    %141 = arith.truncf %140 : vector<64x128xf32> to vector<64x128xbf16>
    %142 = vector.extract_strided_slice %141 {offsets = [0, 0], sizes = [16, 128], strides = [1, 1]} : vector<64x128xbf16> to vector<16x128xbf16>
    %c0_105 = arith.constant 0 : index
    %c0_106 = arith.constant 0 : index
    %143 = vector.load %arg5[%c0_105, %c0_106] : memref<64x128xbf16, #tpu.memory_space<vmem>>, vector<16x128xbf16>
    tpu.vector_store %arg5[%c0_105, %c0_106], %142 {strides = array<i32>} : memref<64x128xbf16, #tpu.memory_space<vmem>>, vector<16x128xbf16>,
    %144 = vector.extract_strided_slice %141 {offsets = [32, 0], sizes = [16, 128], strides = [1, 1]} : vector<64x128xbf16> to vector<16x128xbf16>
    %c32_107 = arith.constant 32 : index
    %c0_108 = arith.constant 0 : index
    %145 = vector.load %arg5[%c32_107, %c0_108] : memref<64x128xbf16, #tpu.memory_space<vmem>>, vector<16x128xbf16>
    tpu.vector_store %arg5[%c32_107, %c0_108], %144 {strides = array<i32>} : memref<64x128xbf16, #tpu.memory_space<vmem>>, vector<16x128xbf16>,
    %c0_109 = arith.constant 0 : index
    %c0_110 = arith.constant 0 : index
    %146 = vector.load %arg5[%c0_109, %c0_110] : memref<64x128xbf16, #tpu.memory_space<vmem>>, vector<64x128xbf16>
    %147 = arith.extf %146 : vector<64x128xbf16> to vector<64x128xf32>
    %c1_i32_111 = arith.constant 1 : i32
    %148 = tpu.dynamic_rotate %147 by %c1_i32_111 dim 0 : vector<64x128xf32>, i32 -> vector<64x128xf32>
    %149 = arith.truncf %148 : vector<64x128xf32> to vector<64x128xbf16>
    %c63_i32_112 = arith.constant 63 : i32
    %150 = tpu.dynamic_rotate %147 by %c63_i32_112 dim 0 : vector<64x128xf32>, i32 -> vector<64x128xf32>
    %151 = arith.truncf %150 : vector<64x128xf32> to vector<64x128xbf16>
    %152 = tpu.concatenate %149, %146, %151 in 1 : vector<64x128xbf16>, vector<64x128xbf16>, vector<64x128xbf16> -> vector<64x384xbf16>
    %c6 = arith.constant 6 : index
    %c0_113 = arith.constant 0 : index
    %c0_114 = arith.constant 0 : index
    %153 = vector.load %arg2[%c6, %c0_113, %c0_114] : memref<7x384x128xbf16, #tpu.memory_space<vmem>>, vector<1x384x128xbf16>
    %154 = vector.shape_cast %153 : vector<1x384x128xbf16> to vector<384x128xbf16>
    %cst_115 = arith.constant dense<0.000000e+00> : vector<64x128xf32>
    %155 = tpu.matmul %152, %154, %cst_115 {dimension_numbers = #tpu.dot_dimension_numbers<[1], [0], [0], [1], [0, 0, 1, 1], [], []>} : vector<64x384xbf16>, vector<384x128xbf16>, vector<64x128xf32> -> vector<64x128xf32>
    %c6_116 = arith.constant 6 : index
    %c0_117 = arith.constant 0 : index
    %c0_118 = arith.constant 0 : index
    %156 = vector.load %arg3[%c6_116, %c0_117, %c0_118] : memref<7x1x128xf32, #tpu.memory_space<vmem>>, vector<1x1x128xf32>
    %157 = vector.shape_cast %156 : vector<1x1x128xf32> to vector<1x128xf32>
    %158 = vector.broadcast %157 : vector<1x128xf32> to vector<64x128xf32>
    %159 = arith.addf %155, %158 : vector<64x128xf32>
    %160 = vector.extract_strided_slice %159 {offsets = [0, 0], sizes = [16, 128], strides = [1, 1]} : vector<64x128xf32> to vector<16x128xf32>
    %c0_119 = arith.constant 0 : index
    %c0_120 = arith.constant 0 : index
    %c0_121 = arith.constant 0 : index
    %161 = vector.load %arg4[%c0_119, %c0_120, %c0_121] : memref<2x16x128xf32, #tpu.memory_space<vmem>>, vector<1x16x128xf32>
    %162 = vector.shape_cast %161 : vector<1x16x128xf32> to vector<16x128xf32>
    %163 = vector.shape_cast %160 : vector<16x128xf32> to vector<1x16x128xf32>
    tpu.vector_store %arg4[%c0_119, %c0_120, %c0_121], %163 {strides = array<i32>} : memref<2x16x128xf32, #tpu.memory_space<vmem>>, vector<1x16x128xf32>,
    %164 = vector.extract_strided_slice %159 {offsets = [32, 0], sizes = [16, 128], strides = [1, 1]} : vector<64x128xf32> to vector<16x128xf32>
    %c1_122 = arith.constant 1 : index
    %c0_123 = arith.constant 0 : index
    %c0_124 = arith.constant 0 : index
    %165 = vector.load %arg4[%c1_122, %c0_123, %c0_124] : memref<2x16x128xf32, #tpu.memory_space<vmem>>, vector<1x16x128xf32>
    %166 = vector.shape_cast %165 : vector<1x16x128xf32> to vector<16x128xf32>
    %167 = vector.shape_cast %164 : vector<16x128xf32> to vector<1x16x128xf32>
    tpu.vector_store %arg4[%c1_122, %c0_123, %c0_124], %167 {strides = array<i32>} : memref<2x16x128xf32, #tpu.memory_space<vmem>>, vector<1x16x128xf32>,
    return
  }
  func.func @transform_0(%arg0: i32) -> (i32, i32, i32) {
    %c0_i32 = arith.constant 0 : i32
    %c0_i32_0 = arith.constant 0 : i32
    %c0_i32_1 = arith.constant 0 : i32
    %c0_i32_2 = arith.constant 0 : i32
    return %c0_i32, %c0_i32_0, %c0_i32_1 : i32, i32, i32
  }
  func.func @transform_1(%arg0: i32) -> (i32, i32, i32) {
    %c0_i32 = arith.constant 0 : i32
    %c0_i32_0 = arith.constant 0 : i32
    %c0_i32_1 = arith.constant 0 : i32
    %c0_i32_2 = arith.constant 0 : i32
    return %c0_i32, %c0_i32_0, %c0_i32_1 : i32, i32, i32
  }
  func.func @transform_2(%arg0: i32) -> (i32, i32, i32) {
    %c0_i32 = arith.constant 0 : i32
    %c0_i32_0 = arith.constant 0 : i32
    %c0_i32_1 = arith.constant 0 : i32
    %c0_i32_2 = arith.constant 0 : i32
    return %c0_i32, %c0_i32_0, %c0_i32_1 : i32, i32, i32
  }
  func.func @transform_3(%arg0: i32) -> (i32, i32, i32) {
    %c0_i32 = arith.constant 0 : i32
    %c0_i32_0 = arith.constant 0 : i32
    %c0_i32_1 = arith.constant 0 : i32
    %c0_i32_2 = arith.constant 0 : i32
    return %c0_i32, %c0_i32_0, %c0_i32_1 : i32, i32, i32
  }
}

</mosaic_0001>

<bundles_post_ra>
// kernel: tpu_custom_call.1
= control target key start
LH: loop header
LB: loop body
LE: loop exit
PB: predicated region body
PF: predicated region fallthrough
CT: control target
= control target key end

     0   :  { %8 = vsyncpa [#allocation5], 0  ;;  %s4202_s0 = inlined_call_operand.hbm [shape: f32[2,16,128], index: 0, kind: input, shape index: {}]   ;;  %s4203_s1 = inlined_call_operand.hbm [shape: bf16[7,384,128], index: 1, kind: input, shape index: {}]   ;;  %s4204_s2 = inlined_call_operand.vmem [shape: f32[7,1,128], index: 2, kind: input, shape index: {}]   ;;  %s4205_s3 = inlined_call_operand.hbm [shape: f32[2,16,128], index: 3, kind: output, shape index: {}]  }
   0x1   :  { %9 = vsyncpa [#allocation8], 0 }
   0x2   :  { %10 = vsyncpa [#allocation6], 0  ;;  %s3760_s12 = smov [#allocation4]   ;;  %s3688_s16 = scalar_lea.hbm %s4202_s0, 512 }
   0x3   :  { %s16_s13 = sshll.u32 %s3760_s12, 4  ;;  %p3689_p0 = scmp.ne.s32.totalorder %s4202_s0, %s3688_s16  ;;  %s17_s13 = int_to_ptr.vmem [resolvable:$true] %s16_s13 }
   0x4   :  { %p3692_p1 = scmp.lt.u32.totalorder %s3688_s16, %s4202_s0 }
   0x6   :  { %p3694_p2 = pnand %p3692_p1, %p3689_p0 }
   0x8   :  { %3697 = shalt.err (!%p3694_p2)
}
   0x9   :  { %s3698_s21 = scalar_lea.vmem %s17_s13, 512  ;;  %p3703_p4 = scmp.lt.s32.totalorder %s17_s13, %s17_s13 }
   0xa   :  { %p3699_p3 = scmp.ne.s32.totalorder %s17_s13, %s3698_s21  ;;  %p3704_p5 = scmp.lt.s32.totalorder %s3698_s21, %s3698_s21 }
   0xc   :  { %p3705_p6 = por %p3704_p5, %p3703_p4 }
   0xe   :  { %p3706_p7 = pnand %p3705_p6, %p3699_p3 }
  0x10   :  { %3709 = shalt.err (!%p3706_p7)
}
  0x11   :  { %s3761_s22 = smov 128   ;;  %s3762_s23 = smov 8  }
  0x12   :  { %22 = dma.hbm_to_vmem [thread:$0]  %s4202_s0, 512, %s17_s13, [#allocation5], %s3761_s22, %s3761_s22, %s3762_s23  }
  0x13   :  { %s3763_s26 = smov [#allocation7]   ;;  %s3710_s30 = scalar_lea.hbm %s4203_s1, 21504 }
  0x14   :  { %s28_s27 = sshll.u32 %s3763_s26, 4  ;;  %p3711_p8 = scmp.ne.s32.totalorder %s4203_s1, %s3710_s30  ;;  %s29_s27 = int_to_ptr.vmem [resolvable:$true] %s28_s27 }
  0x15   :  { %p3714_p9 = scmp.lt.u32.totalorder %s3710_s30, %s4203_s1 }
  0x17   :  { %p3716_p10 = pnand %p3714_p9, %p3711_p8 }
  0x19   :  { %3719 = shalt.err (!%p3716_p10)
}
  0x1a   :  { %s3720_s8 = scalar_lea.vmem %s29_s27, 21504  ;;  %p3725_p12 = scmp.lt.s32.totalorder %s29_s27, %s29_s27 }
  0x1b   :  { %p3721_p11 = scmp.ne.s32.totalorder %s29_s27, %s3720_s8  ;;  %p3726_p13 = scmp.lt.s32.totalorder %s3720_s8, %s3720_s8 }
  0x1d   :  { %p3727_p0 = por %p3726_p13, %p3725_p12 }
  0x1f   :  { %p3728_p1 = pnand %p3727_p0, %p3721_p11 }
  0x21   :  { %3731 = shalt.err (!%p3728_p1)
}
  0x22   :  { %s3764_s0 = smov 64   ;;  %s3765_s9 = smov 4  }
  0x23   :  { %34 = dma.hbm_to_vmem [thread:$0]  %s4203_s1, 21504, %s29_s27, [#allocation8], %s3764_s0, %s3764_s0, %s3765_s9  }
  0x24   :  { %3754 = dma.done.wait [#allocation5], 512  }
  0x25   :  { %3755 = vsyncadd [#allocation5], 4294966784 }
  0x26   :  { %3756 = dma.done.wait [#allocation8], 21504  }
  0x27   :  { %3757 = vsyncadd [#allocation8], 4294945792  ;;  %v3520_v0 = vld [vmem:[#allocation7 + $0x40] sm:$0xff]   ;;  %v3522_v2 = vld [vmem:[#allocation7 + $0x48] sm:$0xff]   ;;  %v85_v17 = vlaneseq  ;;  %v3766_v19 = vmov 0  }
  0x28   :  { %v3521_v1 = vld [vmem:[#allocation7] sm:$0xff]   ;;  %2980 = vmatprep.subr.bf16.mxu0 %v3520_v0  ;;  %v3524_v4 = vld [vmem:[#allocation7 + $0x8] sm:$0xff]   ;;  %v3525_v5 = vld [vmem:[#allocation7 + $0x50] sm:$0xff]   ;;  %v72_v20 = vunpack.c.h.bf16 %v3766_v19  ;;  %v71_v22 = vunpack.c.l.bf16 %v3766_v19 }
  0x29   :  { %2981 = vmatpush3.bf16.msra.mxu0 %v3521_v1  ;;  %v3523_v3 = vld [vmem:[#allocation7 + $0x80] sm:$0xff]   ;;  %v3526_v6 = vld [vmem:[#allocation7 + $0x88] sm:$0xff]   ;;  %v3527_v7 = vld [vmem:[#allocation7 + $0x10] sm:$0xff]   ;;  %v3817_v25 = vshrl.u32 %v85_v17, 7 }
  0x2a   :  { %2982 = vmatprep.subr.bf16.mxu0 %v3522_v2  ;;  %3344 = vmatprep.subr.bf16.mxu1 %v3523_v3  ;;  %v3528_v8 = vld [vmem:[#allocation7 + $0x58] sm:$0xff]   ;;  %v3529_v9 = vld [vmem:[#allocation7 + $0x90] sm:$0xff]   ;;  %v3531_v11 = vld [vmem:[#allocation7 + $0x60] sm:$0xff]   ;;  %v3819_v28 = vrot.slane %v72_v20, 7  ;;  %v3821_v31 = vrot.slane %v71_v22, 1  ;;  %v3823_v33 = vrot.slane %v72_v20, 1 }
  0x2b   :  { %3345 = vmatpush3.bf16.msra.mxu1 %v3523_v3  ;;  %v3530_v10 = vld [vmem:[#allocation7 + $0x18] sm:$0xff]   ;;  %v3533_v13 = vld [vmem:[#allocation7 + $0x20] sm:$0xff]   ;;  %v3534_v15 = vld [vmem:[#allocation7 + $0x68] sm:$0xff]   ;;  %v3825_v35 = vrot.slane %v71_v22, 7  ;;  %vm87_vm0 = vcmp.lt.s32.totalorder %v3817_v25, 1  ;;  %vm108_vm1 = vcmp.lt.s32.totalorder %v3817_v25, 7 }
  0x2c   :  { %3346 = vmatprep.subr.bf16.mxu1 %v3526_v6  ;;  %v3532_v12 = vld [vmem:[#allocation7 + $0x98] sm:$0xff]   ;;  %v3535_v14 = vld [vmem:[#allocation7 + $0xa0] sm:$0xff]   ;;  %v3536_v16 = vld [vmem:[#allocation7 + $0x28] sm:$0xff]   ;;  %v3856_v55 = vsel %vm108_vm1, %v3821_v31, %v3823_v33 }
  0x2d   :  { %2983 = vmatpush3.bf16.msra.mxu0 %v3524_v4  ;;  %v3538_v18 = vld [vmem:[#allocation7 + $0xa8] sm:$0xff]   ;;  %v3537_v21 = vld [vmem:[#allocation7 + $0x70] sm:$0xff]   ;;  %v48_v26 = vld [vmem:[#allocation4] sm:$0xff]  ;;  %v3870_v0 = vsel %vm87_vm0, %v3825_v35, %v3819_v28 }
  0x2e   :  { %2984 = vmatprep.subr.bf16.mxu0 %v3525_v5  ;;  %v3539_v23 = vld [vmem:[#allocation7 + $0x30] sm:$0xff]   ;;  %v49_v27 = vld [vmem:[#allocation4 + $0x8] sm:$0xff]  ;;  %v3540_v29 = vld [vmem:[#allocation7 + $0x78] sm:$0xff]  }
  0x2f   :  { %3347 = vmatpush3.bf16.msra.mxu1 %v3526_v6  ;;  %v3541_v24 = vld [vmem:[#allocation7 + $0xb0] sm:$0xff]   ;;  %v50_v30 = vpack.c.bf16 %v49_v27, %v48_v26  ;;  %v54_v34 = vld [vmem:[#allocation4 + $0x18] sm:$0xff]  ;;  %v3544_v45 = vld [vmem:[#allocation7 + $0x100] sm:$0xff]  }
  0x30   :  { %3348 = vmatprep.subr.bf16.mxu1 %v3529_v9  ;;  %v53_v32 = vld [vmem:[#allocation4 + $0x10] sm:$0xff]  ;;  %v3542_v36 = vld [vmem:[#allocation7 + $0x38] sm:$0xff]   ;;  %v3545_v56 = vld [vmem:[#allocation7 + $0xc0] sm:$0xff]  }
  0x31   :  { %2985 = vmatpush3.bf16.msra.mxu0 %v3527_v7  ;;  %v3827_v37 = vunpack.c.l.bf16 %v50_v30  ;;  %v3829_v38 = vunpack.c.h.bf16 %v50_v30  ;;  %352 = vmatprep.mubr.bf16.mxu0 %v50_v30  ;;  %v55_v39 = vpack.c.bf16 %v54_v34, %v53_v32  ;;  %v3543_v40 = vld [vmem:[#allocation7 + $0xb8] sm:$0xff]   ;;  %v3546_v60 = vld [vmem:[#allocation7 + $0x108] sm:$0xff]   ;;  %v3548_v4 = vld [vmem:[#allocation7 + $0x110] sm:$0xff]  }
  0x32   :  { %2986 = vmatprep.subr.bf16.mxu0 %v3528_v8  ;;  %v3547_v63 = vld [vmem:[#allocation7 + $0xc8] sm:$0xff]   ;;  %v3549_v8 = vld [vmem:[#allocation7 + $0xd0] sm:$0xff]   ;;  %v3554_v17 = vld [vmem:[#allocation7 + $0xe0] sm:$0xff]  }
  0x33   :  { %3349 = vmatpush3.bf16.msra.mxu1 %v3529_v9  ;;  %v77_v41 = vrot.slane %v3827_v37, 7  ;;  %v78_v42 = vrot.slane %v3829_v38, 7  ;;  %v100_v43 = vrot.slane %v3827_v37, 1  ;;  %v101_v44 = vrot.slane %v3829_v38, 1  ;;  %v3550_v9 = vld [vmem:[#allocation7 + $0x118] sm:$0xff]   ;;  %v3556_v20 = vld [vmem:[#allocation7 + $0x128] sm:$0xff]  }
  0x34   :  { %3350 = vmatprep.subr.bf16.mxu1 %v3532_v12  ;;  %v3837_v46 = vunpack.c.l.bf16 %v55_v39  ;;  %v3839_v47 = vunpack.c.h.bf16 %v55_v39  ;;  %v3558_v22 = vld [vmem:[#allocation7 + $0x150] sm:$0xff]   ;;  %v3562_v30 = vld [vmem:[#allocation7 + $0x138] sm:$0xff]   ;;  %v3564_v34 = vld [vmem:[#allocation7 + $0x160] sm:$0xff]  }
  0x35   :  { %2987 = vmatpush3.bf16.msra.mxu0 %v3530_v10  ;;  %v94_v48 = vsel %vm87_vm0, %v77_v41, %v78_v42  ;;  %v95_v49 = vsel %vm87_vm0, %v3819_v28, %v77_v41  ;;  %v114_v50 = vsel %vm108_vm1, %v101_v44, %v3821_v31  ;;  %v115_v51 = vsel %vm108_vm1, %v100_v43, %v101_v44  ;;  %v3559_v26 = vld [vmem:[#allocation7 + $0x130] sm:$0xff]   ;;  %v3563_v32 = vld [vmem:[#allocation7 + $0xf8] sm:$0xff]   ;;  %v3568_v41 = vld [vmem:[#allocation7 + $0x1c0] sm:$0xff]  }
  0x36   :  { %2988 = vmatprep.subr.bf16.mxu0 %v3531_v11  ;;  %v96_v52 = vpack.c.bf16 %v94_v48, %v95_v49  ;;  %v117_v53 = vpack.c.bf16 %v114_v50, %v115_v51  ;;  %v104_v54 = vrot.slane %v3837_v46, 1  ;;  %v81_v57 = vrot.slane %v3837_v46, 7  ;;  %v3560_v27 = vld [vmem:[#allocation7 + $0xf0] sm:$0xff]   ;;  %v2799_v44 = vld [vmem:[%s4204_s2] ss:$0 sm:$0xff] }
  0x37   :  { %3351 = vmatpush3.bf16.msra.mxu1 %v3532_v12  ;;  %v82_v58 = vrot.slane %v3839_v47, 7  ;;  %v105_v59 = vrot.slane %v3839_v47, 1  ;;  %v93_v1 = vsel %vm87_vm0, %v78_v42, %v3825_v35  ;;  %v116_v7 = vsel %vm108_vm1, %v3823_v33, %v100_v43 }
  0x38   :  { %3352 = vmatprep.subr.bf16.mxu1 %v3535_v14  ;;  %3360 = vmatprep.mubr.bf16.mxu1 %v117_v53  ;;  %v112_v61 = vsel %vm108_vm1, %v3823_v33, %v104_v54  ;;  %v97_v6 = vpack.c.bf16 %v3870_v0, %v93_v1  ;;  %v120_v10 = vpack.c.bf16 %v116_v7, %v3856_v55 }
  0x39   :  { %2989 = vmatpush3.bf16.msra.mxu0 %v3533_v13  ;;  %v118_v62 = vpack.c.bf16 %v112_v61, %v3856_v55  ;;  %v110_v2 = vsel %vm108_vm1, %v105_v59, %v3821_v31  ;;  %v111_v3 = vsel %vm108_vm1, %v104_v54, %v105_v59  ;;  %v90_v11 = vsel %vm87_vm0, %v81_v57, %v82_v58 }
  0x3a   :  { %2990 = vmatprep.subr.bf16.mxu0 %v3534_v15  ;;  %v119_v5 = vpack.c.bf16 %v110_v2, %v111_v3  ;;  %v91_v12 = vsel %vm87_vm0, %v3819_v28, %v81_v57  ;;  %v3552_v15 = vld [vmem:[#allocation7 + $0x140] sm:$0xff]  }
  0x3b   :  { %3353 = vmatpush3.bf16.msra.mxu1 %v3535_v14  ;;  %v98_v13 = vpack.c.bf16 %v90_v11, %v91_v12  ;;  %v3551_v14 = vld [vmem:[#allocation7 + $0xd8] sm:$0xff]  }
  0x3c   :  { %3354 = vmatprep.subr.bf16.mxu1 %v3538_v18 }
  0x3d   :  { %2991 = vmatpush3.bf16.msra.mxu0 %v3536_v16  ;;  %v3553_v16 = vld [vmem:[#allocation7 + $0x120] sm:$0xff]  }
  0x3e   :  { %2992 = vmatprep.subr.bf16.mxu0 %v3537_v21  ;;  %v3557_v21 = vld [vmem:[#allocation7 + $0xe8] sm:$0xff]  }
  0x3f   :  { %3355 = vmatpush3.bf16.msra.mxu1 %v3538_v18  ;;  %v3555_v18 = vld [vmem:[#allocation7 + $0x148] sm:$0xff]  }
  0x40   :  { %3356 = vmatprep.subr.bf16.mxu1 %v3541_v24 }
  0x41   :  { %2993 = vmatpush3.bf16.msra.mxu0 %v3539_v23  ;;  %v89_v23 = vsel %vm87_vm0, %v82_v58, %v3825_v35 }
  0x42   :  { %2994 = vmatprep.subr.bf16.mxu0 %v3540_v29  ;;  %v3561_v29 = vld [vmem:[#allocation7 + $0x158] sm:$0xff]  }
  0x43   :  { %3357 = vmatpush3.bf16.msra.mxu1 %v3541_v24  ;;  %v99_v24 = vpack.c.bf16 %v3870_v0, %v89_v23 }
  0x44   :  { %3358 = vmatprep.subr.bf16.mxu1 %v3543_v40 }
  0x45   :  { %2995 = vmatpush3.bf16.msra.mxu0 %v3542_v36  ;;  %v3565_v36 = vld [vmem:[#allocation7 + $0x168] sm:$0xff]  }
  0x46   :  { %3032 = vmatprep.subr.bf16.mxu0 %v3544_v45 }
  0x47   :  { %3359 = vmatpush3.bf16.msra.mxu1 %v3543_v40  ;;  %v3567_v40 = vld [vmem:[#allocation7 + $0x178] sm:$0xff]  }
  0x48   :  { %353 = vmatmul.mubr.bf16.vlgmr.msra.gmra.mrb[0].mxu0 %v96_v52  ;;  %3368 = vmatprep.subr.bf16.mxu1 %v3552_v15 }
  0x49   :  { %360 = vmatprep.mubr.bf16.mxu0 %v3766_v19  ;;  %3033 = vmatpush3.bf16.msra.mxu0 %v3545_v56 }
  0x4a   :  { %3361 = vmatmul.mubr.bf16.vlgmr.msra.gmra.mrb[0].mxu1 %v118_v62  ;;  %3034 = vmatprep.subr.bf16.mxu0 %v3546_v60 }
  0x4b   :  { %3364 = vmatprep.mubr.bf16.mxu1 %v119_v5  ;;  %3369 = vmatpush3.bf16.msra.mxu1 %v3552_v15 }
  0x4c   :  { %3370 = vmatprep.subr.bf16.mxu1 %v3555_v18 }
  0x4d   :  { %3035 = vmatpush3.bf16.msra.mxu0 %v3547_v63 }
  0x4e   :  { %3036 = vmatprep.subr.bf16.mxu0 %v3548_v4 }
  0x4f   :  { %3371 = vmatpush3.bf16.msra.mxu1 %v3555_v18 }
  0x50   :  { %361 = vmatmul.mubr.bf16.gmra.mrb[4].mxu0 %v97_v6  ;;  %3372 = vmatprep.subr.bf16.mxu1 %v3558_v22 }
  0x51   :  { %366 = vmatprep.mubr.bf16.mxu0 %v55_v39  ;;  %3037 = vmatpush3.bf16.msra.mxu0 %v3549_v8  ;;  %v3566_v39 = vld [vmem:[#allocation7 + $0x170] sm:$0xff]  }
  0x52   :  { %3365 = vmatmul.mubr.bf16.gmra.mrb[4].mxu1 %v120_v10  ;;  %3038 = vmatprep.subr.bf16.mxu0 %v3550_v9 }
  0x53   :  { %3373 = vmatpush3.bf16.msra.mxu1 %v3558_v22 }
  0x54   :  { %3374 = vmatprep.subr.bf16.mxu1 %v3561_v29 }
  0x55   :  { %3039 = vmatpush3.bf16.msra.mxu0 %v3551_v14 }
  0x56   :  { %3040 = vmatprep.subr.bf16.mxu0 %v3553_v16 }
  0x57   :  { %3375 = vmatpush3.bf16.msra.mxu1 %v3561_v29 }
  0x58   :  { %367 = vmatmul.mubr.bf16.gmra.mrb[8].mxu0 %v98_v13  ;;  %3376 = vmatprep.subr.bf16.mxu1 %v3564_v34 }
  0x59   :  { %374 = vmatprep.mubr.bf16.mxu0 %v3766_v19  ;;  %3041 = vmatpush3.bf16.msra.mxu0 %v3554_v17 }
  0x5a   :  { %3042 = vmatprep.subr.bf16.mxu0 %v3556_v20  ;;  %v3569_v20 = vld [vmem:[#allocation7 + $0x180] sm:$0xff]  }
  0x5b   :  { %3377 = vmatpush3.bf16.msra.mxu1 %v3564_v34 }
  0x5c   :  { %3378 = vmatprep.subr.bf16.mxu1 %v3565_v36 }
  0x5d   :  { %3043 = vmatpush3.bf16.msra.mxu0 %v3557_v21 }
  0x5e   :  { %3044 = vmatprep.subr.bf16.mxu0 %v3559_v26 }
  0x5f   :  { %3379 = vmatpush3.bf16.msra.mxu1 %v3565_v36 }
  0x60   :  { %375 = vmatmul.mubr.bf16.gmra.mrb[12].mxu0 %v99_v24  ;;  %3380 = vmatprep.subr.bf16.mxu1 %v3566_v39 }
  0x61   :  { %3045 = vmatpush3.bf16.msra.mxu0 %v3560_v27 }
  0x62   :  { %3046 = vmatprep.subr.bf16.mxu0 %v3562_v30 }
  0x63   :  { %3381 = vmatpush3.bf16.msra.mxu1 %v3566_v39 }
  0x64   :  { %3382 = vmatprep.subr.bf16.mxu1 %v3567_v40 }
  0x65   :  { %3047 = vmatpush3.bf16.msra.mxu0 %v3563_v32 }
  0x66   :  { %3084 = vmatprep.subr.bf16.mxu0 %v3568_v41 }
  0x67   :  { %3383 = vmatpush3.bf16.msra.mxu1 %v3567_v40 }
 0x11b   :  { %v2996_v42 = vpop.f32.mrb[0].mxu0 }
 0x11c   :  { %v2997_v43 = vpop.f32.mrb[1].mxu0 }
 0x11d   :  { %v2998_v45 = vadd.f32 %v2997_v43, %v2996_v42  ;;  %v2999_v48 = vpop.f32.mrb[2].mxu0  ;;  %v3362_v50 = vpop.f32.mrb[0].mxu1 }
 0x11e   :  { %v3000_v49 = vpop.f32.mrb[3].mxu0  ;;  %v415_v53 = vpop.f32.mrb[1].mxu1 }
 0x11f   :  { %v3001_v51 = vadd.f32 %v3000_v49, %v2999_v48  ;;  %v355_v52 = vadd.f32 %v2998_v45, %v2799_v44  ;;  %v3363_v54 = vpop.f32.mrb[2].mxu1 }
 0x120   :  { %v418_v58 = vpop.f32.mrb[3].mxu1 }
 0x121   :  { %v416_v56 = vadd.f32 %v415_v53, %v355_v52  ;;  %v358_v57 = vadd.f32 %v3001_v51, %v2799_v44 }
 0x123   :  { %v442_v59 = vmul.f32 0.2, %v416_v56  ;;  %v419_v60 = vadd.f32 %v418_v58, %v358_v57  ;;  %v3002_v61 = vpop.f32.mrb[4].mxu0 }
 0x124   :  { %v3003_v62 = vpop.f32.mrb[5].mxu0 }
 0x125   :  { %v446_v63 = vmax.f32 %v416_v56, %v442_v59  ;;  %v443_v1 = vmul.f32 0.2, %v419_v60  ;;  %v3005_v2 = vpop.f32.mrb[6].mxu0  ;;  %v3366_v4 = vpop.f32.mrb[4].mxu1 }
 0x126   :  { %v3006_v3 = vpop.f32.mrb[7].mxu0  ;;  %v429_v7 = vpop.f32.mrb[5].mxu1 }
 0x127   :  { %v466_v5 = vrot.slane %v446_v63, 7  ;;  %v447_v6 = vmax.f32 %v419_v60, %v443_v1  ;;  %v3367_v8 = vpop.f32.mrb[6].mxu1  ;;  %v486_v9 = vrot.slane %v446_v63, 1 }
 0x128   :  { %v432_v13 = vpop.f32.mrb[7].mxu1  ;;  %v3572_v8 = vld [vmem:[#allocation7 + $0x1d0] sm:$0xff]  }
 0x129   :  { %v467_v10 = vrot.slane %v447_v6, 7  ;;  %v487_v11 = vrot.slane %v447_v6, 1  ;;  %v450_v12 = vpack.c.bf16 %v447_v6, %v446_v63  ;;  %v481_v14 = vsel %vm87_vm0, %v3819_v28, %v466_v5  ;;  %v3570_v6 = vld [vmem:[#allocation7 + $0x1c8] sm:$0xff]  }
 0x12a   :  { %v501_v61 = vsel %vm108_vm1, %v3823_v33, %v486_v9 }
 0x12b   :  { %v480_v15 = vsel %vm87_vm0, %v466_v5, %v467_v10  ;;  %v3008_v16 = vpop.f32.mrb[8].mxu0  ;;  %739 = vmatprep.mubr.bf16.mxu0 %v450_v12  ;;  %v499_v17 = vsel %vm108_vm1, %v487_v11, %v3821_v31  ;;  %v500_v18 = vsel %vm108_vm1, %v486_v9, %v487_v11  ;;  %v479_v36 = vsel %vm87_vm0, %v467_v10, %v3825_v35  ;;  %v3574_v9 = vld [vmem:[#allocation7 + $0x200] sm:$0xff]   ;;  %v3573_v10 = vld [vmem:[#allocation7 + $0x190] sm:$0xff]   ;;  %v3575_v11 = vld [vmem:[#allocation7 + $0x1d8] sm:$0xff]  }
 0x12c   :  { %v3009_v21 = vpop.f32.mrb[9].mxu0  ;;  %v482_v22 = vpack.c.bf16 %v480_v15, %v481_v14  ;;  %v502_v23 = vpack.c.bf16 %v499_v17, %v500_v18  ;;  %v483_v41 = vpack.c.bf16 %v3870_v0, %v479_v36  ;;  %v505_v63 = vpack.c.bf16 %v501_v61, %v3856_v55  ;;  %3392 = vmatprep.subr.bf16.mxu1 %v3574_v9  ;;  %v3576_v12 = vld [vmem:[#allocation7 + $0x198] sm:$0xff]   ;;  %v3578_v14 = vld [vmem:[#allocation7 + $0x1e0] sm:$0xff]   ;;  %v3580_v15 = vld [vmem:[#allocation7 + $0x210] sm:$0xff]  }
 0x12d   :  { %v3010_v24 = vadd.f32 %v3009_v21, %v3008_v16  ;;  %v3011_v26 = vpop.f32.mrb[10].mxu0  ;;  %v3579_v16 = vld [vmem:[#allocation7 + $0x1a0] sm:$0xff]   ;;  %v3581_v17 = vld [vmem:[#allocation7 + $0x1e8] sm:$0xff]   ;;  %v3583_v18 = vld [vmem:[#allocation7 + $0x218] sm:$0xff]  }
 0x12e   :  { %v3012_v27 = vpop.f32.mrb[11].mxu0  ;;  %740 = vmatmul.mubr.bf16.vlgmr.msra.gmra.mrb[16].mxu0 %v482_v22  ;;  %3384 = vmatprep.mubr.bf16.mxu1 %v502_v23  ;;  %v3584_v21 = vld [vmem:[#allocation7 + $0x1f0] sm:$0xff]   ;;  %v3586_v22 = vld [vmem:[#allocation7 + $0x220] sm:$0xff]  }
 0x12f   :  { %v369_v29 = vadd.f32 %v3010_v24, %v2799_v44  ;;  %v3013_v30 = vadd.f32 %v3012_v27, %v3011_v26  ;;  %747 = vmatprep.mubr.bf16.mxu0 %v3766_v19  ;;  %3085 = vmatpush3.bf16.msra.mxu0 %v3569_v20  ;;  %v3582_v20 = vld [vmem:[#allocation7 + $0x1a8] sm:$0xff]   ;;  %v3585_v23 = vld [vmem:[#allocation7 + $0x1b0] sm:$0xff]   ;;  %v3587_v24 = vld [vmem:[#allocation7 + $0x1f8] sm:$0xff]  }
 0x130   :  { %3086 = vmatprep.subr.bf16.mxu0 %v3570_v6  ;;  %v3589_v26 = vld [vmem:[#allocation7 + $0x228] sm:$0xff]   ;;  %v3588_v27 = vld [vmem:[#allocation7 + $0x1b8] sm:$0xff]  }
 0x131   :  { %v430_v32 = vadd.f32 %v429_v7, %v369_v29  ;;  %v372_v34 = vadd.f32 %v3013_v30, %v2799_v44  ;;  %v3571_v7 = vld [vmem:[#allocation7 + $0x188] sm:$0xff]   ;;  %v3590_v29 = vld [vmem:[#allocation7 + $0x230] sm:$0xff]   ;;  %v3591_v30 = vld [vmem:[#allocation7 + $0x238] sm:$0xff]  }
 0x133   :  { %v444_v39 = vmul.f32 0.2, %v430_v32  ;;  %v433_v40 = vadd.f32 %v432_v13, %v372_v34  ;;  %v3014_v2 = vpop.f32.mrb[12].mxu0  ;;  %3087 = vmatpush3.bf16.msra.mxu0 %v3571_v7  ;;  %v3577_v13 = vld [vmem:[#allocation7 + $0x208] sm:$0xff]  }
 0x134   :  { %v3015_v3 = vpop.f32.mrb[13].mxu0  ;;  %3088 = vmatprep.subr.bf16.mxu0 %v3572_v8 }
 0x135   :  { %v448_v42 = vmax.f32 %v430_v32, %v444_v39  ;;  %v445_v43 = vmul.f32 0.2, %v433_v40  ;;  %v3017_v4 = vpop.f32.mrb[14].mxu0  ;;  %v3592_v32 = vld [vmem:[#allocation7 + $0x280] sm:$0xff]  }
 0x136   :  { %748 = vmatmul.mubr.bf16.gmra.mrb[20].mxu0 %v483_v41  ;;  %v3018_v5 = vpop.f32.mrb[15].mxu0 }
 0x137   :  { %v470_v45 = vrot.slane %v448_v42, 7  ;;  %v490_v48 = vrot.slane %v448_v42, 1  ;;  %v449_v49 = vmax.f32 %v433_v40, %v445_v43  ;;  %3089 = vmatpush3.bf16.msra.mxu0 %v3573_v10 }
 0x138   :  { %3090 = vmatprep.subr.bf16.mxu0 %v3575_v11 }
 0x139   :  { %v497_v50 = vsel %vm108_vm1, %v3823_v33, %v490_v48  ;;  %v471_v51 = vrot.slane %v449_v49, 7  ;;  %v491_v44 = vrot.slane %v449_v49, 1  ;;  %v451_v52 = vpack.c.bf16 %v449_v49, %v448_v42 }
 0x13a   :  { %v503_v53 = vpack.c.bf16 %v497_v50, %v3856_v55  ;;  %v477_v56 = vsel %vm87_vm0, %v3819_v28, %v470_v45  ;;  %v2825_v50 = vld [vmem:[%s4204_s2 + $0x1] ss:$0 sm:$0xff] }
 0x13b   :  { %753 = vmatprep.mubr.bf16.mxu0 %v451_v52  ;;  %v476_v54 = vsel %vm87_vm0, %v470_v45, %v471_v51  ;;  %v495_v57 = vsel %vm108_vm1, %v491_v44, %v3821_v31  ;;  %v496_v58 = vsel %vm108_vm1, %v490_v48, %v491_v44  ;;  %v475_v62 = vsel %vm87_vm0, %v471_v51, %v3825_v35 }
 0x13c   :  { %3385 = vmatmul.mubr.bf16.vlgmr.msra.gmra.mrb[8].mxu1 %v503_v53  ;;  %v484_v59 = vpack.c.bf16 %v476_v54, %v477_v56  ;;  %v504_v60 = vpack.c.bf16 %v495_v57, %v496_v58  ;;  %v485_v1 = vpack.c.bf16 %v3870_v0, %v475_v62  ;;  %3091 = vmatpush3.bf16.msra.mxu0 %v3576_v12 }
 0x13d   :  { %3393 = vmatpush3.bf16.msra.mxu1 %v3574_v9  ;;  %3092 = vmatprep.subr.bf16.mxu0 %v3578_v14 }
 0x13e   :  { %754 = vmatmul.mubr.bf16.gmra.mrb[24].mxu0 %v484_v59  ;;  %3388 = vmatprep.mubr.bf16.mxu1 %v504_v60 }
 0x13f   :  { %761 = vmatprep.mubr.bf16.mxu0 %v3766_v19  ;;  %3394 = vmatprep.subr.bf16.mxu1 %v3577_v13 }
 0x140   :  { %3093 = vmatpush3.bf16.msra.mxu0 %v3579_v16 }
 0x141   :  { %3395 = vmatpush3.bf16.msra.mxu1 %v3577_v13  ;;  %3094 = vmatprep.subr.bf16.mxu0 %v3581_v17 }
 0x142   :  { %3396 = vmatprep.subr.bf16.mxu1 %v3580_v15 }
 0x144   :  { %3389 = vmatmul.mubr.bf16.gmra.mrb[12].mxu1 %v505_v63  ;;  %3095 = vmatpush3.bf16.msra.mxu0 %v3582_v20 }
 0x145   :  { %3397 = vmatpush3.bf16.msra.mxu1 %v3580_v15  ;;  %3096 = vmatprep.subr.bf16.mxu0 %v3584_v21 }
 0x146   :  { %762 = vmatmul.mubr.bf16.gmra.mrb[28].mxu0 %v485_v1  ;;  %3398 = vmatprep.subr.bf16.mxu1 %v3583_v18 }
 0x148   :  { %3097 = vmatpush3.bf16.msra.mxu0 %v3585_v23 }
 0x149   :  { %3399 = vmatpush3.bf16.msra.mxu1 %v3583_v18  ;;  %3098 = vmatprep.subr.bf16.mxu0 %v3587_v24 }
 0x14a   :  { %3400 = vmatprep.subr.bf16.mxu1 %v3586_v22 }
 0x14c   :  { %3099 = vmatpush3.bf16.msra.mxu0 %v3588_v27 }
 0x14d   :  { %3401 = vmatpush3.bf16.msra.mxu1 %v3586_v22  ;;  %3136 = vmatprep.subr.bf16.mxu0 %v3592_v32  ;;  %v3593_v32 = vld [vmem:[#allocation7 + $0x240] sm:$0xff]  }
 0x14e   :  { %3402 = vmatprep.subr.bf16.mxu1 %v3589_v26 }
 0x151   :  { %3403 = vmatpush3.bf16.msra.mxu1 %v3589_v26 }
 0x152   :  { %3404 = vmatprep.subr.bf16.mxu1 %v3590_v29 }
 0x155   :  { %3405 = vmatpush3.bf16.msra.mxu1 %v3590_v29 }
 0x156   :  { %3406 = vmatprep.subr.bf16.mxu1 %v3591_v30 }
 0x159   :  { %3407 = vmatpush3.bf16.msra.mxu1 %v3591_v30 }
 0x201   :  { %v3048_v34 = vpop.f32.mrb[16].mxu0 }
 0x202   :  { %v3049_v36 = vpop.f32.mrb[17].mxu0 }
 0x203   :  { %v3050_v39 = vadd.f32 %v3049_v36, %v3048_v34  ;;  %v3051_v40 = vpop.f32.mrb[18].mxu0  ;;  %v3594_v36 = vld [vmem:[#allocation7 + $0x288] sm:$0xff]  }
 0x204   :  { %v3052_v41 = vpop.f32.mrb[19].mxu0 }
 0x205   :  { %v3053_v42 = vadd.f32 %v3052_v41, %v3051_v40  ;;  %v742_v44 = vadd.f32 %v3050_v39, %v2825_v50  ;;  %v3595_v40 = vld [vmem:[#allocation7 + $0x248] sm:$0xff]  }
 0x207   :  { %v745_v57 = vadd.f32 %v3053_v42, %v2825_v50 }
 0x209   :  { %v3054_v43 = vpop.f32.mrb[20].mxu0 }
 0x20a   :  { %v3055_v45 = vpop.f32.mrb[21].mxu0 }
 0x20b   :  { %v3057_v48 = vpop.f32.mrb[22].mxu0  ;;  %v3596_v45 = vld [vmem:[#allocation7 + $0x290] sm:$0xff]  }
 0x20c   :  { %v3058_v49 = vpop.f32.mrb[23].mxu0 }
 0x20f   :  { %v3386_v51 = vpop.f32.mrb[8].mxu1 }
 0x210   :  { %v802_v52 = vpop.f32.mrb[9].mxu1 }
 0x211   :  { %v803_v53 = vadd.f32 %v802_v52, %v742_v44  ;;  %v3060_v54 = vpop.f32.mrb[24].mxu0  ;;  %v3387_v56 = vpop.f32.mrb[10].mxu1 }
 0x212   :  { %v3061_v58 = vpop.f32.mrb[25].mxu0  ;;  %v805_v59 = vpop.f32.mrb[11].mxu1 }
 0x213   :  { %v3062_v60 = vadd.f32 %v3061_v58, %v3060_v54  ;;  %v806_v61 = vadd.f32 %v805_v59, %v745_v57  ;;  %v3063_v62 = vpop.f32.mrb[26].mxu0  ;;  %v835_v1 = vadd.f32 %v803_v53, %v3827_v37 }
 0x214   :  { %v3064_v63 = vpop.f32.mrb[27].mxu0 }
 0x215   :  { %v836_v2 = vadd.f32 %v806_v61, %v3829_v38  ;;  %v3065_v3 = vadd.f32 %v3064_v63, %v3063_v62  ;;  %v756_v5 = vadd.f32 %v3062_v60, %v2825_v50  ;;  %v3597_v63 = vld [vmem:[#allocation7 + $0x250] sm:$0xff]  }
 0x217   :  { %v3390_v4 = vpop.f32.mrb[12].mxu1  ;;  %v839_v6 = vpack.c.bf16 %v836_v2, %v835_v1  ;;  %v759_v13 = vadd.f32 %v3065_v3, %v2825_v50  ;;  %v3598_v1 = vld [vmem:[#allocation7 + $0x2c0] sm:$0xff]   ;;  %v3599_v2 = vld [vmem:[#allocation7 + $0x298] sm:$0xff]  }
 0x218   :  { %v816_v7 = vpop.f32.mrb[13].mxu1  ;;  %3416 = vmatprep.subr.bf16.mxu1 %v3598_v1  ;;  %v3600_v3 = vld [vmem:[#allocation7 + $0x258] sm:$0xff]   ;;  %v3601_v4 = vld [vmem:[#allocation7 + $0x2c8] sm:$0xff]  }
 0x219   :  { %v817_v8 = vadd.f32 %v816_v7, %v756_v5  ;;  %v3066_v9 = vpop.f32.mrb[28].mxu0  ;;  %v3391_v10 = vpop.f32.mrb[14].mxu1  ;;  %v3941_v11 = vunpack.c.l.bf16 %v839_v6  ;;  %v3943_v12 = vunpack.c.h.bf16 %v839_v6  ;;  %1136 = vmatprep.mubr.bf16.mxu0 %v839_v6  ;;  %v3602_v5 = vld [vmem:[#allocation7 + $0x2a0] sm:$0xff]   ;;  %v3604_v7 = vld [vmem:[#allocation7 + $0x2d0] sm:$0xff]  }
 0x21a   :  { %v3067_v14 = vpop.f32.mrb[29].mxu0  ;;  %v819_v15 = vpop.f32.mrb[15].mxu1  ;;  %v3603_v6 = vld [vmem:[#allocation7 + $0x260] sm:$0xff]   ;;  %v3606_v9 = vld [vmem:[#allocation7 + $0x268] sm:$0xff]   ;;  %v3607_v10 = vld [vmem:[#allocation7 + $0x2d8] sm:$0xff]  }
 0x21b   :  { %v863_v37 = vrot.slane %v3941_v11, 7  ;;  %v864_v38 = vrot.slane %v3943_v12, 7  ;;  %v820_v16 = vadd.f32 %v819_v15, %v759_v13  ;;  %v3069_v17 = vpop.f32.mrb[30].mxu0  ;;  %v883_v20 = vrot.slane %v3941_v11, 1  ;;  %v3608_v13 = vld [vmem:[#allocation7 + $0x2b0] sm:$0xff]   ;;  %v3610_v15 = vld [vmem:[#allocation7 + $0x2e0] sm:$0xff]  }
 0x21c   :  { %v3070_v18 = vpop.f32.mrb[31].mxu0  ;;  %v884_v21 = vrot.slane %v3943_v12, 1  ;;  %v837_v22 = vadd.f32 %v817_v8, %v3837_v46  ;;  %v3605_v8 = vld [vmem:[#allocation7 + $0x2a8] sm:$0xff]   ;;  %v3609_v14 = vld [vmem:[#allocation7 + $0x270] sm:$0xff]  }
 0x21d   :  { %v838_v23 = vadd.f32 %v820_v16, %v3839_v47  ;;  %v877_v24 = vsel %vm87_vm0, %v863_v37, %v864_v38  ;;  %v878_v26 = vsel %vm87_vm0, %v3819_v28, %v863_v37  ;;  %v876_v42 = vsel %vm87_vm0, %v864_v38, %v3825_v35  ;;  %v3611_v37 = vld [vmem:[#allocation7 + $0x2b8] sm:$0xff]   ;;  %v3613_v16 = vld [vmem:[#allocation7 + $0x2e8] sm:$0xff]   ;;  %v3614_v17 = vld [vmem:[#allocation7 + $0x2f0] sm:$0xff]  }
 0x21e   :  { %v879_v27 = vpack.c.bf16 %v877_v24, %v878_v26  ;;  %v896_v29 = vsel %vm108_vm1, %v884_v21, %v3821_v31  ;;  %v897_v30 = vsel %vm108_vm1, %v883_v20, %v884_v21  ;;  %v880_v51 = vpack.c.bf16 %v3870_v0, %v876_v42  ;;  %v3612_v38 = vld [vmem:[#allocation7 + $0x278] sm:$0xff]   ;;  %v3997_v21 = vld [vmem:[#allocation7 + $0x380] sm:$0xff]  }
 0x21f   :  { %v840_v34 = vpack.c.bf16 %v838_v23, %v837_v22  ;;  %v899_v46 = vpack.c.bf16 %v896_v29, %v897_v30  ;;  %v898_v58 = vsel %vm108_vm1, %v3823_v33, %v883_v20  ;;  %v3615_v18 = vld [vmem:[#allocation7 + $0x2f8] sm:$0xff]   ;;  %v3616_v20 = vld [vmem:[#allocation7 + $0x340] sm:$0xff]  }
 0x220   :  { %1137 = vmatmul.mubr.bf16.vlgmr.msra.gmra.mrb[32].mxu0 %v879_v27  ;;  %v902_v60 = vpack.c.bf16 %v898_v58, %v3856_v55  ;;  %v2851_v30 = vld [vmem:[%s4204_s2 + $0x2] ss:$0 sm:$0xff] }
 0x221   :  { %v3961_v47 = vunpack.c.l.bf16 %v840_v34  ;;  %v3963_v39 = vunpack.c.h.bf16 %v840_v34  ;;  %3408 = vmatprep.mubr.bf16.mxu1 %v899_v46  ;;  %1144 = vmatprep.mubr.bf16.mxu0 %v3766_v19 }
 0x222   :  { %3137 = vmatpush3.bf16.msra.mxu0 %v3593_v32 }
 0x223   :  { %v887_v41 = vrot.slane %v3961_v47, 1  ;;  %v888_v43 = vrot.slane %v3963_v39, 1  ;;  %3138 = vmatprep.subr.bf16.mxu0 %v3594_v36  ;;  %v867_v53 = vrot.slane %v3961_v47, 7  ;;  %v868_v54 = vrot.slane %v3963_v39, 7 }
 0x225   :  { %v894_v48 = vsel %vm108_vm1, %v3823_v33, %v887_v41  ;;  %v892_v49 = vsel %vm108_vm1, %v888_v43, %v3821_v31  ;;  %v893_v50 = vsel %vm108_vm1, %v887_v41, %v888_v43  ;;  %v873_v56 = vsel %vm87_vm0, %v867_v53, %v868_v54 }
 0x226   :  { %v900_v44 = vpack.c.bf16 %v894_v48, %v3856_v55  ;;  %v901_v52 = vpack.c.bf16 %v892_v49, %v893_v50  ;;  %3139 = vmatpush3.bf16.msra.mxu0 %v3595_v40  ;;  %v874_v57 = vsel %vm87_vm0, %v3819_v28, %v867_v53  ;;  %v872_v61 = vsel %vm87_vm0, %v868_v54, %v3825_v35 }
 0x227   :  { %3140 = vmatprep.subr.bf16.mxu0 %v3596_v45  ;;  %v881_v59 = vpack.c.bf16 %v873_v56, %v874_v57  ;;  %v882_v62 = vpack.c.bf16 %v3870_v0, %v872_v61 }
 0x228   :  { %1145 = vmatmul.mubr.bf16.gmra.mrb[36].mxu0 %v880_v51  ;;  %3409 = vmatmul.mubr.bf16.vlgmr.msra.gmra.mrb[16].mxu1 %v900_v44 }
 0x229   :  { %1150 = vmatprep.mubr.bf16.mxu0 %v840_v34  ;;  %3412 = vmatprep.mubr.bf16.mxu1 %v901_v52 }
 0x22a   :  { %3141 = vmatpush3.bf16.msra.mxu0 %v3597_v63  ;;  %3417 = vmatpush3.bf16.msra.mxu1 %v3598_v1 }
 0x22b   :  { %3142 = vmatprep.subr.bf16.mxu0 %v3599_v2  ;;  %3418 = vmatprep.subr.bf16.mxu1 %v3601_v4 }
 0x22e   :  { %3143 = vmatpush3.bf16.msra.mxu0 %v3600_v3  ;;  %3419 = vmatpush3.bf16.msra.mxu1 %v3601_v4 }
 0x22f   :  { %3144 = vmatprep.subr.bf16.mxu0 %v3602_v5  ;;  %3420 = vmatprep.subr.bf16.mxu1 %v3604_v7 }
 0x230   :  { %1151 = vmatmul.mubr.bf16.gmra.mrb[40].mxu0 %v881_v59  ;;  %3413 = vmatmul.mubr.bf16.gmra.mrb[20].mxu1 %v902_v60 }
 0x231   :  { %1158 = vmatprep.mubr.bf16.mxu0 %v3766_v19 }
 0x232   :  { %3145 = vmatpush3.bf16.msra.mxu0 %v3603_v6  ;;  %3421 = vmatpush3.bf16.msra.mxu1 %v3604_v7 }
 0x233   :  { %3146 = vmatprep.subr.bf16.mxu0 %v3605_v8  ;;  %3422 = vmatprep.subr.bf16.mxu1 %v3607_v10 }
 0x236   :  { %3147 = vmatpush3.bf16.msra.mxu0 %v3606_v9  ;;  %3423 = vmatpush3.bf16.msra.mxu1 %v3607_v10 }
 0x237   :  { %3148 = vmatprep.subr.bf16.mxu0 %v3608_v13  ;;  %3424 = vmatprep.subr.bf16.mxu1 %v3610_v15 }
 0x238   :  { %1159 = vmatmul.mubr.bf16.gmra.mrb[44].mxu0 %v882_v62 }
 0x23a   :  { %3149 = vmatpush3.bf16.msra.mxu0 %v3609_v14  ;;  %3425 = vmatpush3.bf16.msra.mxu1 %v3610_v15  ;;  %v3617_v15 = vld [vmem:[#allocation7 + $0x300] sm:$0xff]  }
 0x23b   :  { %3150 = vmatprep.subr.bf16.mxu0 %v3611_v37  ;;  %3426 = vmatprep.subr.bf16.mxu1 %v3613_v16 }
 0x23e   :  { %3151 = vmatpush3.bf16.msra.mxu0 %v3612_v38  ;;  %3427 = vmatpush3.bf16.msra.mxu1 %v3613_v16 }
 0x23f   :  { %3428 = vmatprep.subr.bf16.mxu1 %v3614_v17  ;;  %3188 = vmatprep.subr.bf16.mxu0 %v3616_v20 }
 0x242   :  { %3429 = vmatpush3.bf16.msra.mxu1 %v3614_v17  ;;  %v3618_v17 = vld [vmem:[#allocation7 + $0x348] sm:$0xff]  }
 0x243   :  { %3430 = vmatprep.subr.bf16.mxu1 %v3615_v18 }
 0x246   :  { %3431 = vmatpush3.bf16.msra.mxu1 %v3615_v18 }
 0x247   :  { %3440 = vmatprep.subr.bf16.mxu1 %v3997_v21 }
 0x2f3   :  { %v3100_v22 = vpop.f32.mrb[32].mxu0 }
 0x2f4   :  { %v3101_v23 = vpop.f32.mrb[33].mxu0 }
 0x2f5   :  { %v3102_v24 = vadd.f32 %v3101_v23, %v3100_v22  ;;  %v3103_v26 = vpop.f32.mrb[34].mxu0 }
 0x2f6   :  { %v3104_v27 = vpop.f32.mrb[35].mxu0 }
 0x2f7   :  { %v3105_v29 = vadd.f32 %v3104_v27, %v3103_v26  ;;  %v1139_v46 = vadd.f32 %v3102_v24, %v2851_v30  ;;  %v3619_v24 = vld [vmem:[#allocation7 + $0x308] sm:$0xff]  }
 0x2f9   :  { %v1142_v45 = vadd.f32 %v3105_v29, %v2851_v30 }
 0x2fb   :  { %v3106_v32 = vpop.f32.mrb[36].mxu0  ;;  %v3410_v34 = vpop.f32.mrb[16].mxu1 }
 0x2fc   :  { %v3107_v36 = vpop.f32.mrb[37].mxu0  ;;  %v1199_v40 = vpop.f32.mrb[17].mxu1 }
 0x2fd   :  { %v1200_v41 = vadd.f32 %v1199_v40, %v1139_v46  ;;  %v3109_v42 = vpop.f32.mrb[38].mxu0  ;;  %v3411_v43 = vpop.f32.mrb[18].mxu1 }
 0x2fe   :  { %v3110_v48 = vpop.f32.mrb[39].mxu0  ;;  %v1202_v49 = vpop.f32.mrb[19].mxu1  ;;  %v3621_v42 = vld [vmem:[#allocation7 + $0x310] sm:$0xff]  }
 0x2ff   :  { %v1226_v50 = vmul.f32 0.2, %v1200_v41  ;;  %v1203_v51 = vadd.f32 %v1202_v49, %v1142_v45 }
 0x301   :  { %v4003_v44 = vmax.f32 %v1200_v41, %v1226_v50  ;;  %v1227_v52 = vmul.f32 0.2, %v1203_v51 }
 0x303   :  { %v1250_v53 = vrot.slane %v4003_v44, 7  ;;  %v1231_v54 = vmax.f32 %v1203_v51, %v1227_v52  ;;  %v3112_v56 = vpop.f32.mrb[40].mxu0  ;;  %v3414_v57 = vpop.f32.mrb[20].mxu1  ;;  %v1270_v3 = vrot.slane %v4003_v44, 1 }
 0x304   :  { %v3113_v58 = vpop.f32.mrb[41].mxu0  ;;  %v1213_v59 = vpop.f32.mrb[21].mxu1 }
 0x305   :  { %v1251_v60 = vrot.slane %v1231_v54, 7  ;;  %v1271_v61 = vrot.slane %v1231_v54, 1  ;;  %v3114_v62 = vadd.f32 %v3113_v58, %v3112_v56  ;;  %v3115_v63 = vpop.f32.mrb[42].mxu0  ;;  %v3415_v1 = vpop.f32.mrb[22].mxu1  ;;  %v1265_v2 = vsel %vm87_vm0, %v3819_v28, %v1250_v53 }
 0x306   :  { %v3116_v4 = vpop.f32.mrb[43].mxu0  ;;  %v1216_v5 = vpop.f32.mrb[23].mxu1  ;;  %v1234_v6 = vpack.c.bf16 %v1231_v54, %v4003_v44  ;;  %v1285_v57 = vsel %vm108_vm1, %v3823_v33, %v1270_v3  ;;  %v3628_v1 = vld [vmem:[#allocation7 + $0x390] sm:$0xff]  }
 0x307   :  { %v1264_v7 = vsel %vm87_vm0, %v1250_v53, %v1251_v60  ;;  %v1153_v8 = vadd.f32 %v3114_v62, %v2851_v30  ;;  %v3117_v9 = vadd.f32 %v3116_v4, %v3115_v63  ;;  %v1283_v10 = vsel %vm108_vm1, %v1271_v61, %v3821_v31  ;;  %v3624_v62 = vld [vmem:[#allocation7 + $0x318] sm:$0xff]   ;;  %v3626_v63 = vld [vmem:[#allocation7 + $0x360] sm:$0xff]  }
 0x308   :  { %1523 = vmatprep.mubr.bf16.mxu0 %v1234_v6  ;;  %v1266_v13 = vpack.c.bf16 %v1264_v7, %v1265_v2  ;;  %v1284_v14 = vsel %vm108_vm1, %v1270_v3, %v1271_v61  ;;  %v1263_v32 = vsel %vm87_vm0, %v1251_v60, %v3825_v35  ;;  %v1289_v58 = vpack.c.bf16 %v1285_v57, %v3856_v55  ;;  %v3623_v61 = vld [vmem:[#allocation7 + $0x358] sm:$0xff]   ;;  %v3627_v2 = vld [vmem:[#allocation7 + $0x320] sm:$0xff]   ;;  %v3629_v3 = vld [vmem:[#allocation7 + $0x368] sm:$0xff]  }
 0x309   :  { %v1214_v37 = vadd.f32 %v1213_v59, %v1153_v8  ;;  %v1156_v38 = vadd.f32 %v3117_v9, %v2851_v30  ;;  %v1286_v16 = vpack.c.bf16 %v1283_v10, %v1284_v14  ;;  %v3620_v30 = vld [vmem:[#allocation7 + $0x350] sm:$0xff]   ;;  %v1267_v41 = vpack.c.bf16 %v3870_v0, %v1263_v32  ;;  %v3631_v4 = vld [vmem:[#allocation7 + $0x398] sm:$0xff]   ;;  %v3634_v7 = vld [vmem:[#allocation7 + $0x3a0] sm:$0xff]  }
 0x30a   :  { %1524 = vmatmul.mubr.bf16.vlgmr.msra.gmra.mrb[48].mxu0 %v1266_v13  ;;  %v3632_v6 = vld [vmem:[#allocation7 + $0x370] sm:$0xff]   ;;  %v3635_v9 = vld [vmem:[#allocation7 + $0x378] sm:$0xff]   ;;  %v3637_v10 = vld [vmem:[#allocation7 + $0x3a8] sm:$0xff]  }
 0x30b   :  { %v1228_v18 = vmul.f32 0.2, %v1214_v37  ;;  %v1217_v20 = vadd.f32 %v1216_v5, %v1156_v38  ;;  %3432 = vmatprep.mubr.bf16.mxu1 %v1286_v16  ;;  %v3118_v22 = vpop.f32.mrb[44].mxu0  ;;  %1531 = vmatprep.mubr.bf16.mxu0 %v3766_v19  ;;  %v3630_v5 = vld [vmem:[#allocation7 + $0x328] sm:$0xff]   ;;  %v3633_v8 = vld [vmem:[#allocation7 + $0x330] sm:$0xff]   ;;  %v3636_v13 = vld [vmem:[#allocation7 + $0x338] sm:$0xff]  }
 0x30c   :  { %v3119_v23 = vpop.f32.mrb[45].mxu0  ;;  %3189 = vmatpush3.bf16.msra.mxu0 %v3617_v15  ;;  %v3638_v14 = vld [vmem:[#allocation7 + $0x3b0] sm:$0xff]   ;;  %v3639_v15 = vld [vmem:[#allocation7 + $0x3b8] sm:$0xff]  }
 0x30d   :  { %v1232_v26 = vmax.f32 %v1214_v37, %v1228_v18  ;;  %v1229_v27 = vmul.f32 0.2, %v1217_v20  ;;  %v3121_v29 = vpop.f32.mrb[46].mxu0  ;;  %3190 = vmatprep.subr.bf16.mxu0 %v3618_v17  ;;  %v3640_v37 = vld [vmem:[#allocation7 + $0x400] sm:$0xff]  }
 0x30e   :  { %v3122_v34 = vpop.f32.mrb[47].mxu0  ;;  %v2877_v23 = vld [vmem:[%s4204_s2 + $0x3] ss:$0 sm:$0xff] }
 0x30f   :  { %v1254_v46 = vrot.slane %v1232_v26, 7  ;;  %v1274_v36 = vrot.slane %v1232_v26, 1  ;;  %v1233_v40 = vmax.f32 %v1217_v20, %v1229_v27 }
 0x310   :  { %3191 = vmatpush3.bf16.msra.mxu0 %v3619_v24 }
 0x311   :  { %v1281_v43 = vsel %vm108_vm1, %v3823_v33, %v1274_v36  ;;  %v1255_v45 = vrot.slane %v1233_v40, 7  ;;  %v1275_v48 = vrot.slane %v1233_v40, 1  ;;  %v1235_v49 = vpack.c.bf16 %v1233_v40, %v1232_v26  ;;  %3192 = vmatprep.subr.bf16.mxu0 %v3620_v30 }
 0x312   :  { %1532 = vmatmul.mubr.bf16.gmra.mrb[52].mxu0 %v1267_v41  ;;  %v1287_v50 = vpack.c.bf16 %v1281_v43, %v3856_v55  ;;  %v1261_v53 = vsel %vm87_vm0, %v3819_v28, %v1254_v46 }
 0x313   :  { %1537 = vmatprep.mubr.bf16.mxu0 %v1235_v49  ;;  %v1279_v51 = vsel %vm108_vm1, %v1275_v48, %v3821_v31  ;;  %v1280_v44 = vsel %vm108_vm1, %v1274_v36, %v1275_v48  ;;  %v1260_v52 = vsel %vm87_vm0, %v1254_v46, %v1255_v45  ;;  %v1259_v59 = vsel %vm87_vm0, %v1255_v45, %v3825_v35 }
 0x314   :  { %3433 = vmatmul.mubr.bf16.vlgmr.msra.gmra.mrb[24].mxu1 %v1287_v50  ;;  %v1288_v54 = vpack.c.bf16 %v1279_v51, %v1280_v44  ;;  %v1268_v56 = vpack.c.bf16 %v1260_v52, %v1261_v53  ;;  %3193 = vmatpush3.bf16.msra.mxu0 %v3621_v42  ;;  %v1269_v60 = vpack.c.bf16 %v3870_v0, %v1259_v59 }
 0x315   :  { %3441 = vmatpush3.bf16.msra.mxu1 %v3997_v21  ;;  %v3625_v21 = vld [vmem:[#allocation7 + $0x388] sm:$0xff]   ;;  %3194 = vmatprep.subr.bf16.mxu0 %v3623_v61 }
 0x316   :  { %3436 = vmatprep.mubr.bf16.mxu1 %v1288_v54  ;;  %3442 = vmatprep.subr.bf16.mxu1 %v3625_v21 }
 0x318   :  { %3195 = vmatpush3.bf16.msra.mxu0 %v3624_v62 }
 0x319   :  { %3443 = vmatpush3.bf16.msra.mxu1 %v3625_v21  ;;  %3196 = vmatprep.subr.bf16.mxu0 %v3626_v63 }
 0x31a   :  { %1538 = vmatmul.mubr.bf16.gmra.mrb[56].mxu0 %v1268_v56  ;;  %3444 = vmatprep.subr.bf16.mxu1 %v3628_v1 }
 0x31b   :  { %1545 = vmatprep.mubr.bf16.mxu0 %v3766_v19 }
 0x31c   :  { %3437 = vmatmul.mubr.bf16.gmra.mrb[28].mxu1 %v1289_v58  ;;  %3197 = vmatpush3.bf16.msra.mxu0 %v3627_v2 }
 0x31d   :  { %3445 = vmatpush3.bf16.msra.mxu1 %v3628_v1  ;;  %3198 = vmatprep.subr.bf16.mxu0 %v3629_v3  ;;  %v3641_v3 = vld [vmem:[#allocation7 + $0x3c0] sm:$0xff]  }
 0x31e   :  { %3446 = vmatprep.subr.bf16.mxu1 %v3631_v4 }
 0x320   :  { %3199 = vmatpush3.bf16.msra.mxu0 %v3630_v5 }
 0x321   :  { %3447 = vmatpush3.bf16.msra.mxu1 %v3631_v4  ;;  %3200 = vmatprep.subr.bf16.mxu0 %v3632_v6 }
 0x322   :  { %1546 = vmatmul.mubr.bf16.gmra.mrb[60].mxu0 %v1269_v60  ;;  %3448 = vmatprep.subr.bf16.mxu1 %v3634_v7 }
 0x324   :  { %3201 = vmatpush3.bf16.msra.mxu0 %v3633_v8 }
 0x325   :  { %3449 = vmatpush3.bf16.msra.mxu1 %v3634_v7  ;;  %3202 = vmatprep.subr.bf16.mxu0 %v3635_v9  ;;  %v3642_v7 = vld [vmem:[#allocation7 + $0x408] sm:$0xff]  }
 0x326   :  { %3450 = vmatprep.subr.bf16.mxu1 %v3637_v10 }
 0x328   :  { %3203 = vmatpush3.bf16.msra.mxu0 %v3636_v13 }
 0x329   :  { %3451 = vmatpush3.bf16.msra.mxu1 %v3637_v10  ;;  %3240 = vmatprep.subr.bf16.mxu0 %v3640_v37 }
 0x32a   :  { %3452 = vmatprep.subr.bf16.mxu1 %v3638_v14 }
 0x32d   :  { %3453 = vmatpush3.bf16.msra.mxu1 %v3638_v14  ;;  %v3643_v14 = vld [vmem:[#allocation7 + $0x3c8] sm:$0xff]  }
 0x32e   :  { %3454 = vmatprep.subr.bf16.mxu1 %v3639_v15 }
 0x331   :  { %3455 = vmatpush3.bf16.msra.mxu1 %v3639_v15 }
 0x3dd   :  { %v3152_v38 = vpop.f32.mrb[48].mxu0 }
 0x3de   :  { %v3153_v16 = vpop.f32.mrb[49].mxu0 }
 0x3df   :  { %v3154_v17 = vadd.f32 %v3153_v16, %v3152_v38  ;;  %v3155_v18 = vpop.f32.mrb[50].mxu0 }
 0x3e0   :  { %v3156_v20 = vpop.f32.mrb[51].mxu0 }
 0x3e1   :  { %v3157_v22 = vadd.f32 %v3156_v20, %v3155_v18  ;;  %v1526_v32 = vadd.f32 %v3154_v17, %v2877_v23  ;;  %v3644_v18 = vld [vmem:[#allocation7 + $0x410] sm:$0xff]  }
 0x3e3   :  { %v1529_v40 = vadd.f32 %v3157_v22, %v2877_v23 }
 0x3e5   :  { %v3158_v24 = vpop.f32.mrb[52].mxu0 }
 0x3e6   :  { %v3159_v26 = vpop.f32.mrb[53].mxu0 }
 0x3e7   :  { %v3161_v27 = vpop.f32.mrb[54].mxu0  ;;  %v3434_v29 = vpop.f32.mrb[24].mxu1 }
 0x3e8   :  { %v3162_v30 = vpop.f32.mrb[55].mxu0  ;;  %v1586_v34 = vpop.f32.mrb[25].mxu1 }
 0x3e9   :  { %v1587_v46 = vadd.f32 %v1586_v34, %v1526_v32  ;;  %v3435_v36 = vpop.f32.mrb[26].mxu1 }
 0x3ea   :  { %v1589_v41 = vpop.f32.mrb[27].mxu1 }
 0x3eb   :  { %v4051_v42 = vadd.f32 %v1587_v46, %v3941_v11  ;;  %v1590_v43 = vadd.f32 %v1589_v41, %v1529_v40 }
 0x3ed   :  { %v1639_v45 = vrot.slane %v4051_v42, 7  ;;  %v1620_v48 = vadd.f32 %v1590_v43, %v3943_v12  ;;  %v3164_v49 = vpop.f32.mrb[56].mxu0  ;;  %v1659_v57 = vrot.slane %v4051_v42, 1  ;;  %v3645_v43 = vld [vmem:[#allocation7 + $0x3d0] sm:$0xff]  }
 0x3ee   :  { %v3165_v50 = vpop.f32.mrb[57].mxu0 }
 0x3ef   :  { %v1640_v51 = vrot.slane %v1620_v48, 7  ;;  %v1660_v44 = vrot.slane %v1620_v48, 1  ;;  %v3166_v52 = vadd.f32 %v3165_v50, %v3164_v49  ;;  %v3167_v53 = vpop.f32.mrb[58].mxu0  ;;  %v3438_v54 = vpop.f32.mrb[28].mxu1  ;;  %v1654_v56 = vsel %vm87_vm0, %v3819_v28, %v1639_v45  ;;  %v3648_v49 = vld [vmem:[#allocation7 + $0x3d8] sm:$0xff]   ;;  %v3649_v50 = vld [vmem:[#allocation7 + $0x448] sm:$0xff]  }
 0x3f0   :  { %v3168_v11 = vpop.f32.mrb[59].mxu0  ;;  %v1600_v58 = vpop.f32.mrb[29].mxu1  ;;  %v1623_v59 = vpack.c.bf16 %v1620_v48, %v4051_v42  ;;  %v1674_v36 = vsel %vm108_vm1, %v3823_v33, %v1659_v57  ;;  %v3647_v48 = vld [vmem:[#allocation7 + $0x418] sm:$0xff]   ;;  %v3654_v54 = vld [vmem:[#allocation7 + $0x3e8] sm:$0xff]  }
 0x3f1   :  { %v1653_v12 = vsel %vm87_vm0, %v1639_v45, %v1640_v51  ;;  %v3169_v60 = vadd.f32 %v3168_v11, %v3167_v53  ;;  %v1540_v61 = vadd.f32 %v3166_v52, %v2877_v23  ;;  %v3439_v21 = vpop.f32.mrb[30].mxu1  ;;  %v1672_v62 = vsel %vm108_vm1, %v1660_v44, %v3821_v31  ;;  %v3646_v45 = vld [vmem:[#allocation7 + $0x440] sm:$0xff]   ;;  %v3652_v52 = vld [vmem:[#allocation7 + $0x450] sm:$0xff]   ;;  %v3653_v53 = vld [vmem:[#allocation7 + $0x428] sm:$0xff]  }
 0x3f2   :  { %1912 = vmatprep.mubr.bf16.mxu0 %v1623_v59  ;;  %v1603_v63 = vpop.f32.mrb[31].mxu1  ;;  %v1655_v1 = vpack.c.bf16 %v1653_v12, %v1654_v56  ;;  %v1673_v2 = vsel %vm108_vm1, %v1659_v57, %v1660_v44  ;;  %v1652_v17 = vsel %vm87_vm0, %v1640_v51, %v3825_v35  ;;  %v1678_v40 = vpack.c.bf16 %v1674_v36, %v3856_v55  ;;  %v3650_v51 = vld [vmem:[#allocation7 + $0x420] sm:$0xff]   ;;  %v3655_v56 = vld [vmem:[#allocation7 + $0x458] sm:$0xff]   ;;  %v3656_v57 = vld [vmem:[#allocation7 + $0x430] sm:$0xff]  }
 0x3f3   :  { %v1601_v4 = vadd.f32 %v1600_v58, %v1540_v61  ;;  %v1543_v5 = vadd.f32 %v3169_v60, %v2877_v23  ;;  %v1675_v6 = vpack.c.bf16 %v1672_v62, %v1673_v2  ;;  %v1656_v26 = vpack.c.bf16 %v3870_v0, %v1652_v17  ;;  %3464 = vmatprep.subr.bf16.mxu1 %v3646_v45  ;;  %v3651_v44 = vld [vmem:[#allocation7 + $0x3e0] sm:$0xff]   ;;  %v3657_v11 = vld [vmem:[#allocation7 + $0x3f0] sm:$0xff]   ;;  %v3659_v59 = vld [vmem:[#allocation7 + $0x438] sm:$0xff]  }
 0x3f4   :  { %1913 = vmatmul.mubr.bf16.vlgmr.msra.gmra.mrb[64].mxu0 %v1655_v1  ;;  %v3658_v58 = vld [vmem:[#allocation7 + $0x460] sm:$0xff]   ;;  %v3660_v12 = vld [vmem:[#allocation7 + $0x3f8] sm:$0xff]   ;;  %v3661_v60 = vld [vmem:[#allocation7 + $0x468] sm:$0xff]  }
 0x3f5   :  { %v1621_v8 = vadd.f32 %v1601_v4, %v3961_v47  ;;  %v1604_v9 = vadd.f32 %v1603_v63, %v1543_v5  ;;  %3456 = vmatprep.mubr.bf16.mxu1 %v1675_v6  ;;  %v3170_v10 = vpop.f32.mrb[60].mxu0  ;;  %1920 = vmatprep.mubr.bf16.mxu0 %v3766_v19  ;;  %v3662_v61 = vld [vmem:[#allocation7 + $0x470] sm:$0xff]   ;;  %v3663_v21 = vld [vmem:[#allocation7 + $0x478] sm:$0xff]   ;;  %v3664_v62 = vld [vmem:[#allocation7 + $0x4c0] sm:$0xff]  }
 0x3f6   :  { %v3171_v13 = vpop.f32.mrb[61].mxu0  ;;  %3241 = vmatpush3.bf16.msra.mxu0 %v3641_v3  ;;  %v2903_v6 = vld [vmem:[%s4204_s2 + $0x4] ss:$0 sm:$0xff] }
 0x3f7   :  { %v1643_v15 = vrot.slane %v1621_v8, 7  ;;  %v1663_v37 = vrot.slane %v1621_v8, 1  ;;  %v1622_v38 = vadd.f32 %v1604_v9, %v3963_v39  ;;  %v3173_v16 = vpop.f32.mrb[62].mxu0  ;;  %3242 = vmatprep.subr.bf16.mxu0 %v3642_v7 }
 0x3f8   :  { %v3174_v47 = vpop.f32.mrb[63].mxu0 }
 0x3f9   :  { %v1670_v20 = vsel %vm108_vm1, %v3823_v33, %v1663_v37  ;;  %v1644_v22 = vrot.slane %v1622_v38, 7  ;;  %v1664_v23 = vrot.slane %v1622_v38, 1  ;;  %v1624_v24 = vpack.c.bf16 %v1622_v38, %v1621_v8 }
 0x3fa   :  { %v1676_v27 = vpack.c.bf16 %v1670_v20, %v3856_v55  ;;  %3243 = vmatpush3.bf16.msra.mxu0 %v3643_v14  ;;  %v1650_v30 = vsel %vm87_vm0, %v3819_v28, %v1643_v15 }
 0x3fb   :  { %v1668_v39 = vsel %vm108_vm1, %v1664_v23, %v3821_v31  ;;  %v1669_v29 = vsel %vm108_vm1, %v1663_v37, %v1664_v23  ;;  %v1649_v32 = vsel %vm87_vm0, %v1643_v15, %v1644_v22  ;;  %3244 = vmatprep.subr.bf16.mxu0 %v3644_v18  ;;  %v1648_v41 = vsel %vm87_vm0, %v1644_v22, %v3825_v35 }
 0x3fc   :  { %1921 = vmatmul.mubr.bf16.gmra.mrb[68].mxu0 %v1656_v26  ;;  %3457 = vmatmul.mubr.bf16.vlgmr.msra.gmra.mrb[32].mxu1 %v1676_v27  ;;  %v1677_v34 = vpack.c.bf16 %v1668_v39, %v1669_v29  ;;  %v1657_v46 = vpack.c.bf16 %v1649_v32, %v1650_v30  ;;  %v1658_v42 = vpack.c.bf16 %v3870_v0, %v1648_v41 }
 0x3fd   :  { %1926 = vmatprep.mubr.bf16.mxu0 %v1624_v24  ;;  %3465 = vmatpush3.bf16.msra.mxu1 %v3646_v45 }
 0x3fe   :  { %3460 = vmatprep.mubr.bf16.mxu1 %v1677_v34  ;;  %3245 = vmatpush3.bf16.msra.mxu0 %v3645_v43 }
 0x3ff   :  { %3246 = vmatprep.subr.bf16.mxu0 %v3647_v48  ;;  %3466 = vmatprep.subr.bf16.mxu1 %v3649_v50 }
 0x401   :  { %3467 = vmatpush3.bf16.msra.mxu1 %v3649_v50 }
 0x402   :  { %3247 = vmatpush3.bf16.msra.mxu0 %v3648_v49  ;;  %3468 = vmatprep.subr.bf16.mxu1 %v3652_v52 }
 0x403   :  { %3248 = vmatprep.subr.bf16.mxu0 %v3650_v51 }
 0x404   :  { %1927 = vmatmul.mubr.bf16.gmra.mrb[72].mxu0 %v1657_v46  ;;  %3461 = vmatmul.mubr.bf16.gmra.mrb[36].mxu1 %v1678_v40 }
 0x405   :  { %1934 = vmatprep.mubr.bf16.mxu0 %v3766_v19  ;;  %3469 = vmatpush3.bf16.msra.mxu1 %v3652_v52 }
 0x406   :  { %3249 = vmatpush3.bf16.msra.mxu0 %v3651_v44  ;;  %3470 = vmatprep.subr.bf16.mxu1 %v3655_v56 }
 0x407   :  { %3250 = vmatprep.subr.bf16.mxu0 %v3653_v53  ;;  %v3665_v53 = vld [vmem:[#allocation7 + $0x480] sm:$0xff]  }
 0x409   :  { %3471 = vmatpush3.bf16.msra.mxu1 %v3655_v56 }
 0x40a   :  { %3251 = vmatpush3.bf16.msra.mxu0 %v3654_v54  ;;  %3472 = vmatprep.subr.bf16.mxu1 %v3658_v58 }
 0x40b   :  { %3252 = vmatprep.subr.bf16.mxu0 %v3656_v57 }
 0x40c   :  { %1935 = vmatmul.mubr.bf16.gmra.mrb[76].mxu0 %v1658_v42 }
 0x40d   :  { %3473 = vmatpush3.bf16.msra.mxu1 %v3658_v58 }
 0x40e   :  { %3253 = vmatpush3.bf16.msra.mxu0 %v3657_v11  ;;  %3474 = vmatprep.subr.bf16.mxu1 %v3661_v60  ;;  %v3666_v11 = vld [vmem:[#allocation7 + $0x4c8] sm:$0xff]  }
 0x40f   :  { %3254 = vmatprep.subr.bf16.mxu0 %v3659_v59 }
 0x411   :  { %3475 = vmatpush3.bf16.msra.mxu1 %v3661_v60 }
 0x412   :  { %3255 = vmatpush3.bf16.msra.mxu0 %v3660_v12  ;;  %3476 = vmatprep.subr.bf16.mxu1 %v3662_v61 }
 0x413   :  { %3292 = vmatprep.subr.bf16.mxu0 %v3664_v62 }
 0x415   :  { %3477 = vmatpush3.bf16.msra.mxu1 %v3662_v61  ;;  %v3667_v61 = vld [vmem:[#allocation7 + $0x488] sm:$0xff]  }
 0x416   :  { %3478 = vmatprep.subr.bf16.mxu1 %v3663_v21 }
 0x419   :  { %3479 = vmatpush3.bf16.msra.mxu1 %v3663_v21 }
 0x4c7   :  { %v3204_v63 = vpop.f32.mrb[64].mxu0 }
 0x4c8   :  { %v3205_v1 = vpop.f32.mrb[65].mxu0 }
 0x4c9   :  { %v3206_v2 = vadd.f32 %v3205_v1, %v3204_v63  ;;  %v3207_v3 = vpop.f32.mrb[66].mxu0 }
 0x4ca   :  { %v3208_v4 = vpop.f32.mrb[67].mxu0 }
 0x4cb   :  { %v3209_v5 = vadd.f32 %v3208_v4, %v3207_v3  ;;  %v1915_v9 = vadd.f32 %v3206_v2, %v2903_v6 }
 0x4cd   :  { %v1918_v38 = vadd.f32 %v3209_v5, %v2903_v6 }
 0x4cf   :  { %v3210_v7 = vpop.f32.mrb[68].mxu0  ;;  %v3458_v8 = vpop.f32.mrb[32].mxu1 }
 0x4d0   :  { %v3211_v10 = vpop.f32.mrb[69].mxu0  ;;  %v1975_v13 = vpop.f32.mrb[33].mxu1 }
 0x4d1   :  { %v1976_v14 = vadd.f32 %v1975_v13, %v1915_v9  ;;  %v3213_v15 = vpop.f32.mrb[70].mxu0  ;;  %v3459_v37 = vpop.f32.mrb[34].mxu1 }
 0x4d2   :  { %v3214_v16 = vpop.f32.mrb[71].mxu0  ;;  %v1978_v17 = vpop.f32.mrb[35].mxu1 }
 0x4d3   :  { %v2002_v18 = vmul.f32 0.2, %v1976_v14  ;;  %v1979_v47 = vadd.f32 %v1978_v17, %v1918_v38 }
 0x4d5   :  { %v4100_v20 = vmax.f32 %v1976_v14, %v2002_v18  ;;  %v2003_v22 = vmul.f32 0.2, %v1979_v47 }
 0x4d7   :  { %v2026_v23 = vrot.slane %v4100_v20, 7  ;;  %v2007_v24 = vmax.f32 %v1979_v47, %v2003_v22  ;;  %v3216_v26 = vpop.f32.mrb[72].mxu0  ;;  %v3462_v27 = vpop.f32.mrb[36].mxu1  ;;  %v2046_v41 = vrot.slane %v4100_v20, 1 }
 0x4d8   :  { %v3217_v39 = vpop.f32.mrb[73].mxu0  ;;  %v1989_v29 = vpop.f32.mrb[37].mxu1  ;;  %v3671_v27 = vld [vmem:[#allocation7 + $0x4d8] sm:$0xff]  }
 0x4d9   :  { %v2027_v32 = vrot.slane %v2007_v24, 7  ;;  %v2047_v30 = vrot.slane %v2007_v24, 1  ;;  %v3218_v34 = vadd.f32 %v3217_v39, %v3216_v26  ;;  %v3219_v46 = vpop.f32.mrb[74].mxu0  ;;  %v3463_v36 = vpop.f32.mrb[38].mxu1  ;;  %v2041_v40 = vsel %vm87_vm0, %v3819_v28, %v2026_v23  ;;  %v3669_v26 = vld [vmem:[#allocation7 + $0x490] sm:$0xff]   ;;  %v3672_v39 = vld [vmem:[#allocation7 + $0x498] sm:$0xff]  }
 0x4da   :  { %v3220_v42 = vpop.f32.mrb[75].mxu0  ;;  %v1992_v43 = vpop.f32.mrb[39].mxu1  ;;  %v2010_v45 = vpack.c.bf16 %v2007_v24, %v4100_v20  ;;  %v2061_v18 = vsel %vm108_vm1, %v3823_v33, %v2046_v41  ;;  %v3670_v24 = vld [vmem:[#allocation7 + $0x500] sm:$0xff]   ;;  %v3679_v36 = vld [vmem:[#allocation7 + $0x518] sm:$0xff]  }
 0x4db   :  { %v2040_v48 = vsel %vm87_vm0, %v2026_v23, %v2027_v32  ;;  %v1929_v49 = vadd.f32 %v3218_v34, %v2903_v6  ;;  %v3221_v50 = vadd.f32 %v3220_v42, %v3219_v46  ;;  %v2059_v51 = vsel %vm108_vm1, %v2047_v30, %v3821_v31  ;;  %v3668_v23 = vld [vmem:[#allocation7 + $0x4d0] sm:$0xff]   ;;  %3488 = vmatprep.subr.bf16.mxu1 %v3670_v24  ;;  %v3677_v46 = vld [vmem:[#allocation7 + $0x4e8] sm:$0xff]   ;;  %v3682_v42 = vld [vmem:[#allocation7 + $0x520] sm:$0xff]  }
 0x4dc   :  { %2299 = vmatprep.mubr.bf16.mxu0 %v2010_v45  ;;  %v2042_v44 = vpack.c.bf16 %v2040_v48, %v2041_v40  ;;  %v2060_v52 = vsel %vm108_vm1, %v2046_v41, %v2047_v30  ;;  %v2039_v1 = vsel %vm87_vm0, %v2027_v32, %v3825_v35  ;;  %v2065_v47 = vpack.c.bf16 %v2061_v18, %v3856_v55  ;;  %v3674_v32 = vld [vmem:[#allocation7 + $0x4e0] sm:$0xff]   ;;  %v3676_v34 = vld [vmem:[#allocation7 + $0x510] sm:$0xff]   ;;  %v3678_v40 = vld [vmem:[#allocation7 + $0x4a8] sm:$0xff]  }
 0x4dd   :  { %v1990_v54 = vadd.f32 %v1989_v29, %v1929_v49  ;;  %v1932_v56 = vadd.f32 %v3221_v50, %v2903_v6  ;;  %v2062_v57 = vpack.c.bf16 %v2059_v51, %v2060_v52  ;;  %v2043_v6 = vpack.c.bf16 %v3870_v0, %v2039_v1  ;;  %v3673_v29 = vld [vmem:[#allocation7 + $0x508] sm:$0xff]   ;;  %v3675_v30 = vld [vmem:[#allocation7 + $0x4a0] sm:$0xff]   ;;  %v3680_v41 = vld [vmem:[#allocation7 + $0x4f0] sm:$0xff]  }
 0x4de   :  { %2300 = vmatmul.mubr.bf16.vlgmr.msra.gmra.mrb[80].mxu0 %v2042_v44  ;;  %v3683_v45 = vld [vmem:[#allocation7 + $0x4f8] sm:$0xff]   ;;  %v3685_v48 = vld [vmem:[#allocation7 + $0x528] sm:$0xff]   ;;  %v3686_v50 = vld [vmem:[#allocation7 + $0x530] sm:$0xff]  }
 0x4df   :  { %v2004_v58 = vmul.f32 0.2, %v1990_v54  ;;  %v1993_v59 = vadd.f32 %v1992_v43, %v1932_v56  ;;  %3480 = vmatprep.mubr.bf16.mxu1 %v2062_v57  ;;  %v3222_v12 = vpop.f32.mrb[76].mxu0  ;;  %2307 = vmatprep.mubr.bf16.mxu0 %v3766_v19  ;;  %v3681_v43 = vld [vmem:[#allocation7 + $0x4b0] sm:$0xff]   ;;  %v3684_v49 = vld [vmem:[#allocation7 + $0x4b8] sm:$0xff]  }
 0x4e0   :  { %v3223_v60 = vpop.f32.mrb[77].mxu0  ;;  %3293 = vmatpush3.bf16.msra.mxu0 %v3665_v53  ;;  %v3687_v51 = vld [vmem:[#allocation7 + $0x538] sm:$0xff]  }
 0x4e1   :  { %v2008_v21 = vmax.f32 %v1990_v54, %v2004_v58  ;;  %v2005_v62 = vmul.f32 0.2, %v1993_v59  ;;  %v3225_v63 = vpop.f32.mrb[78].mxu0  ;;  %3294 = vmatprep.subr.bf16.mxu0 %v3666_v11  ;;  %v2929_v11 = vld [vmem:[%s4204_s2 + $0x5] ss:$0 sm:$0xff] }
 0x4e2   :  { %v3226_v2 = vpop.f32.mrb[79].mxu0 }
 0x4e3   :  { %v2030_v3 = vrot.slane %v2008_v21, 7  ;;  %v2050_v4 = vrot.slane %v2008_v21, 1  ;;  %v2009_v5 = vmax.f32 %v1993_v59, %v2005_v62 }
 0x4e4   :  { %3295 = vmatpush3.bf16.msra.mxu0 %v3667_v61 }
 0x4e5   :  { %v2057_v7 = vsel %vm108_vm1, %v3823_v33, %v2050_v4  ;;  %v2031_v8 = vrot.slane %v2009_v5, 7  ;;  %v2051_v9 = vrot.slane %v2009_v5, 1  ;;  %v2011_v10 = vpack.c.bf16 %v2009_v5, %v2008_v21  ;;  %3296 = vmatprep.subr.bf16.mxu0 %v3668_v23 }
 0x4e6   :  { %2308 = vmatmul.mubr.bf16.gmra.mrb[84].mxu0 %v2043_v6  ;;  %v2063_v13 = vpack.c.bf16 %v2057_v7, %v3856_v55  ;;  %v2037_v38 = vsel %vm87_vm0, %v3819_v28, %v2030_v3 }
 0x4e7   :  { %2313 = vmatprep.mubr.bf16.mxu0 %v2011_v10  ;;  %v2055_v14 = vsel %vm108_vm1, %v2051_v9, %v3821_v31  ;;  %v2056_v15 = vsel %vm108_vm1, %v2050_v4, %v2051_v9  ;;  %v2036_v37 = vsel %vm87_vm0, %v2030_v3, %v2031_v8  ;;  %v2035_v20 = vsel %vm87_vm0, %v2031_v8, %v3825_v35 }
 0x4e8   :  { %3481 = vmatmul.mubr.bf16.vlgmr.msra.gmra.mrb[40].mxu1 %v2063_v13  ;;  %v2064_v16 = vpack.c.bf16 %v2055_v14, %v2056_v15  ;;  %v2044_v17 = vpack.c.bf16 %v2036_v37, %v2037_v38  ;;  %v2045_v22 = vpack.c.bf16 %v3870_v0, %v2035_v20  ;;  %3297 = vmatpush3.bf16.msra.mxu0 %v3669_v26 }
 0x4e9   :  { %3489 = vmatpush3.bf16.msra.mxu1 %v3670_v24  ;;  %3298 = vmatprep.subr.bf16.mxu0 %v3671_v27 }
 0x4ea   :  { %3484 = vmatprep.mubr.bf16.mxu1 %v2064_v16  ;;  %3490 = vmatprep.subr.bf16.mxu1 %v3673_v29 }
 0x4ec   :  { %3299 = vmatpush3.bf16.msra.mxu0 %v3672_v39 }
 0x4ed   :  { %3491 = vmatpush3.bf16.msra.mxu1 %v3673_v29  ;;  %3300 = vmatprep.subr.bf16.mxu0 %v3674_v32 }
 0x4ee   :  { %2314 = vmatmul.mubr.bf16.gmra.mrb[88].mxu0 %v2044_v17  ;;  %3492 = vmatprep.subr.bf16.mxu1 %v3676_v34 }
 0x4ef   :  { %2321 = vmatprep.mubr.bf16.mxu0 %v3766_v19 }
 0x4f0   :  { %3485 = vmatmul.mubr.bf16.gmra.mrb[44].mxu1 %v2065_v47  ;;  %3301 = vmatpush3.bf16.msra.mxu0 %v3675_v30 }
 0x4f1   :  { %3493 = vmatpush3.bf16.msra.mxu1 %v3676_v34  ;;  %3302 = vmatprep.subr.bf16.mxu0 %v3677_v46 }
 0x4f2   :  { %3494 = vmatprep.subr.bf16.mxu1 %v3679_v36 }
 0x4f4   :  { %3303 = vmatpush3.bf16.msra.mxu0 %v3678_v40 }
 0x4f5   :  { %3495 = vmatpush3.bf16.msra.mxu1 %v3679_v36  ;;  %3304 = vmatprep.subr.bf16.mxu0 %v3680_v41 }
 0x4f6   :  { %2322 = vmatmul.mubr.bf16.gmra.mrb[92].mxu0 %v2045_v22  ;;  %3496 = vmatprep.subr.bf16.mxu1 %v3682_v42 }
 0x4f8   :  { %3305 = vmatpush3.bf16.msra.mxu0 %v3681_v43 }
 0x4f9   :  { %3497 = vmatpush3.bf16.msra.mxu1 %v3682_v42  ;;  %3306 = vmatprep.subr.bf16.mxu0 %v3683_v45 }
 0x4fa   :  { %3498 = vmatprep.subr.bf16.mxu1 %v3685_v48 }
 0x4fc   :  { %3307 = vmatpush3.bf16.msra.mxu0 %v3684_v49 }
 0x4fd   :  { %3499 = vmatpush3.bf16.msra.mxu1 %v3685_v48 }
 0x4fe   :  { %3500 = vmatprep.subr.bf16.mxu1 %v3686_v50 }
 0x501   :  { %3501 = vmatpush3.bf16.msra.mxu1 %v3686_v50 }
 0x502   :  { %3502 = vmatprep.subr.bf16.mxu1 %v3687_v51 }
 0x505   :  { %3503 = vmatpush3.bf16.msra.mxu1 %v3687_v51 }
 0x5b1   :  { %v3256_v44 = vpop.f32.mrb[80].mxu0 }
 0x5b2   :  { %v3257_v52 = vpop.f32.mrb[81].mxu0 }
 0x5b3   :  { %v3258_v53 = vadd.f32 %v3257_v52, %v3256_v44  ;;  %v3259_v54 = vpop.f32.mrb[82].mxu0 }
 0x5b4   :  { %v3260_v56 = vpop.f32.mrb[83].mxu0 }
 0x5b5   :  { %v3261_v57 = vadd.f32 %v3260_v56, %v3259_v54  ;;  %v2302_v61 = vadd.f32 %v3258_v53, %v2929_v11 }
 0x5b7   :  { %v2305_v2 = vadd.f32 %v3261_v57, %v2929_v11 }
 0x5b9   :  { %v3262_v58 = vpop.f32.mrb[84].mxu0 }
 0x5ba   :  { %v3263_v59 = vpop.f32.mrb[85].mxu0 }
 0x5bb   :  { %v3265_v12 = vpop.f32.mrb[86].mxu0  ;;  %v3482_v60 = vpop.f32.mrb[40].mxu1 }
 0x5bc   :  { %v3266_v21 = vpop.f32.mrb[87].mxu0  ;;  %v2362_v62 = vpop.f32.mrb[41].mxu1 }
 0x5bd   :  { %v2363_v63 = vadd.f32 %v2362_v62, %v2302_v61  ;;  %v3483_v1 = vpop.f32.mrb[42].mxu1 }
 0x5be   :  { %v2365_v3 = vpop.f32.mrb[43].mxu1 }
 0x5bf   :  { %v2389_v4 = vmul.f32 0.2, %v2363_v63  ;;  %v2366_v5 = vadd.f32 %v2365_v3, %v2305_v2 }
 0x5c1   :  { %v2393_v6 = vmax.f32 %v2363_v63, %v2389_v4  ;;  %v2390_v7 = vmul.f32 0.2, %v2366_v5  ;;  %v3268_v8 = vpop.f32.mrb[88].mxu0 }
 0x5c2   :  { %v3269_v9 = vpop.f32.mrb[89].mxu0 }
 0x5c3   :  { %v2413_v10 = vrot.slane %v2393_v6, 7  ;;  %v2394_v13 = vmax.f32 %v2366_v5, %v2390_v7  ;;  %v3270_v14 = vadd.f32 %v3269_v9, %v3268_v8  ;;  %v3271_v15 = vpop.f32.mrb[90].mxu0  ;;  %v3486_v37 = vpop.f32.mrb[44].mxu1  ;;  %v2433_v17 = vrot.slane %v2393_v6, 1 }
 0x5c4   :  { %v3272_v38 = vpop.f32.mrb[91].mxu0  ;;  %v2376_v16 = vpop.f32.mrb[45].mxu1 }
 0x5c5   :  { %v2414_v18 = vrot.slane %v2394_v13, 7  ;;  %v2434_v47 = vrot.slane %v2394_v13, 1  ;;  %v3273_v20 = vadd.f32 %v3272_v38, %v3271_v15  ;;  %v3487_v22 = vpop.f32.mrb[46].mxu1  ;;  %v2428_v23 = vsel %vm87_vm0, %v3819_v28, %v2413_v10 }
 0x5c6   :  { %v2316_v24 = vadd.f32 %v3270_v14, %v2929_v11  ;;  %v2379_v26 = vpop.f32.mrb[47].mxu1  ;;  %v2397_v27 = vpack.c.bf16 %v2394_v13, %v2393_v6 }
 0x5c7   :  { %v2427_v39 = vsel %vm87_vm0, %v2413_v10, %v2414_v18  ;;  %v2319_v29 = vadd.f32 %v3273_v20, %v2929_v11  ;;  %v2446_v32 = vsel %vm108_vm1, %v2434_v47, %v3821_v31  ;;  %v2447_v30 = vsel %vm108_vm1, %v2433_v17, %v2434_v47 }
 0x5c8   :  { %v2377_v34 = vadd.f32 %v2376_v16, %v2316_v24  ;;  %2686 = vmatprep.mubr.bf16.mxu0 %v2397_v27  ;;  %v2429_v46 = vpack.c.bf16 %v2427_v39, %v2428_v23  ;;  %v2449_v36 = vpack.c.bf16 %v2446_v32, %v2447_v30  ;;  %v2426_v44 = vsel %vm87_vm0, %v2414_v18, %v3825_v35 }
 0x5c9   :  { %v2380_v40 = vadd.f32 %v2379_v26, %v2319_v29  ;;  %v3274_v41 = vpop.f32.mrb[92].mxu0  ;;  %v2430_v58 = vpack.c.bf16 %v3870_v0, %v2426_v44 }
 0x5ca   :  { %v2391_v42 = vmul.f32 0.2, %v2377_v34  ;;  %v3275_v43 = vpop.f32.mrb[93].mxu0  ;;  %2687 = vmatmul.mubr.bf16.vlgmr.msra.gmra.mrb[96].mxu0 %v2429_v46  ;;  %3504 = vmatprep.mubr.bf16.mxu1 %v2449_v36 }
 0x5cb   :  { %v2392_v45 = vmul.f32 0.2, %v2380_v40  ;;  %v3277_v48 = vpop.f32.mrb[94].mxu0  ;;  %2694 = vmatprep.mubr.bf16.mxu0 %v3766_v19 }
 0x5cc   :  { %v2395_v49 = vmax.f32 %v2377_v34, %v2391_v42  ;;  %v3278_v50 = vpop.f32.mrb[95].mxu0 }
 0x5cd   :  { %v2396_v51 = vmax.f32 %v2380_v40, %v2392_v45 }
 0x5ce   :  { %v2417_v52 = vrot.slane %v2395_v49, 7  ;;  %v2437_v53 = vrot.slane %v2395_v49, 1 }
 0x5cf   :  { %v2418_v54 = vrot.slane %v2396_v51, 7  ;;  %v2438_v56 = vrot.slane %v2396_v51, 1  ;;  %v2398_v57 = vpack.c.bf16 %v2396_v51, %v2395_v49 }
 0x5d0   :  { %v2444_v11 = vsel %vm108_vm1, %v3823_v33, %v2437_v53  ;;  %v2424_v59 = vsel %vm87_vm0, %v3819_v28, %v2417_v52  ;;  %v2448_v28 = vsel %vm108_vm1, %v3823_v33, %v2433_v17  ;;  %v2955_v33 = vld [vmem:[%s4204_s2 + $0x6] ss:$0 sm:$0xff]  ;;  %s3767_s2 = smov [#allocation9]  }
 0x5d1   :  { %v2450_v12 = vpack.c.bf16 %v2444_v11, %v3856_v55  ;;  %v2442_v60 = vsel %vm108_vm1, %v2438_v56, %v3821_v31  ;;  %v2443_v61 = vsel %vm108_vm1, %v2437_v53, %v2438_v56  ;;  %v2423_v21 = vsel %vm87_vm0, %v2417_v52, %v2418_v54  ;;  %s2786_s27 = sshll.u32 %s3767_s2, 4  ;;  %s2787_s27 = int_to_ptr.vmem [resolvable:$true] %s2786_s27 }
 0x5d2   :  { %2695 = vmatmul.mubr.bf16.gmra.mrb[100].mxu0 %v2430_v58  ;;  %v2451_v62 = vpack.c.bf16 %v2442_v60, %v2443_v61  ;;  %v2431_v63 = vpack.c.bf16 %v2423_v21, %v2424_v59  ;;  %v2452_v1 = vpack.c.bf16 %v2448_v28, %v3856_v55  ;;  %v2422_v31 = vsel %vm87_vm0, %v2418_v54, %v3825_v35  ;;  %s3732_s28 = scalar_lea.vmem %s2787_s27, 512  ;;  %p3737_p3 = scmp.lt.s32.totalorder %s2787_s27, %s2787_s27 }
 0x5d3   :  { %3505 = vmatmul.mubr.bf16.vlgmr.msra.gmra.mrb[48].mxu1 %v2450_v12  ;;  %2700 = vmatprep.mubr.bf16.mxu0 %v2398_v57  ;;  %v2432_v2 = vpack.c.bf16 %v3870_v0, %v2422_v31  ;;  %p3733_p2 = scmp.ne.s32.totalorder %s2787_s27, %s3732_s28  ;;  %p3738_p4 = scmp.lt.s32.totalorder %s3732_s28, %s3732_s28 }
 0x5d4   :  { %3508 = vmatprep.mubr.bf16.mxu1 %v2451_v62 }
 0x5d5   :  { %p3739_p5 = por %p3738_p4, %p3737_p3 }
 0x5d7   :  { %p3740_p6 = pnand %p3739_p5, %p3733_p2 }
 0x5da   :  { %2701 = vmatmul.mubr.bf16.gmra.mrb[104].mxu0 %v2431_v63 }
 0x5db   :  { %3509 = vmatmul.mubr.bf16.gmra.mrb[52].mxu1 %v2452_v1  ;;  %2708 = vmatprep.mubr.bf16.mxu0 %v3766_v19 }
 0x5e2   :  { %2709 = vmatmul.mubr.bf16.gmra.mrb[108].mxu0 %v2432_v2 }
 0x69d   :  { %v3308_v3 = vpop.f32.mrb[96].mxu0 }
 0x69e   :  { %v3309_v4 = vpop.f32.mrb[97].mxu0 }
 0x69f   :  { %v3310_v5 = vadd.f32 %v3309_v4, %v3308_v3  ;;  %v3311_v6 = vpop.f32.mrb[98].mxu0 }
 0x6a0   :  { %v3312_v7 = vpop.f32.mrb[99].mxu0 }
 0x6a1   :  { %v3313_v8 = vadd.f32 %v3312_v7, %v3311_v6  ;;  %v2689_v10 = vadd.f32 %v3310_v5, %v2955_v33 }
 0x6a3   :  { %v2692_v15 = vadd.f32 %v3313_v8, %v2955_v33 }
 0x6a5   :  { %v3314_v55 = vpop.f32.mrb[100].mxu0 }
 0x6a6   :  { %v3506_v9 = vpop.f32.mrb[48].mxu1  ;;  %v3315_v19 = vpop.f32.mrb[101].mxu0 }
 0x6a7   :  { %v2749_v13 = vpop.f32.mrb[49].mxu1  ;;  %v3317_v25 = vpop.f32.mrb[102].mxu0 }
 0x6a8   :  { %v2750_v35 = vadd.f32 %v2749_v13, %v2689_v10  ;;  %v3507_v14 = vpop.f32.mrb[50].mxu1  ;;  %v3318_v0 = vpop.f32.mrb[103].mxu0 }
 0x6a9   :  { %v2752_v37 = vpop.f32.mrb[51].mxu1 }
 0x6aa   :  { %2776 = vst [vmem:[#allocation9] sm:$0xff] %v2750_v35  ;;  %v2753_v38 = vadd.f32 %v2752_v37, %v2692_v15 }
 0x6ac   :  { %2777 = vst [vmem:[#allocation9 + $0x8] sm:$0xff] %v2753_v38 }
 0x6ad   :  { %v3320_v16 = vpop.f32.mrb[104].mxu0 }
 0x6ae   :  { %v3510_v17 = vpop.f32.mrb[52].mxu1  ;;  %v3321_v18 = vpop.f32.mrb[105].mxu0 }
 0x6af   :  { %v3322_v47 = vadd.f32 %v3321_v18, %v3320_v16  ;;  %v2763_v20 = vpop.f32.mrb[53].mxu1  ;;  %v3323_v22 = vpop.f32.mrb[106].mxu0 }
 0x6b0   :  { %v3511_v23 = vpop.f32.mrb[54].mxu1  ;;  %v3324_v24 = vpop.f32.mrb[107].mxu0 }
 0x6b1   :  { %v2703_v26 = vadd.f32 %v3322_v47, %v2955_v33  ;;  %v3325_v27 = vadd.f32 %v3324_v24, %v3323_v22  ;;  %v2766_v39 = vpop.f32.mrb[55].mxu1 }
 0x6b3   :  { %v2764_v29 = vadd.f32 %v2763_v20, %v2703_v26  ;;  %v2706_v32 = vadd.f32 %v3325_v27, %v2955_v33 }
 0x6b5   :  { %2779 = vst [vmem:[#allocation9 + $0x10] sm:$0xff] %v2764_v29  ;;  %v2767_v30 = vadd.f32 %v2766_v39, %v2706_v32  ;;  %v3326_v34 = vpop.f32.mrb[108].mxu0 }
 0x6b6   :  { %v3327_v46 = vpop.f32.mrb[109].mxu0 }
 0x6b7   :  { %2780 = vst [vmem:[#allocation9 + $0x18] sm:$0xff] %v2767_v30  ;;  %v3329_v36 = vpop.f32.mrb[110].mxu0 }
 0x6b8   :  { %v3330_v40 = vpop.f32.mrb[111].mxu0 }
 0x6b9   :  { %3743 = shalt.err (!%p3740_p6)
}
 0x6ba   :  { %s3744_s4 = scalar_lea.hbm %s4205_s3, 512 }
 0x6bb   :  { %p3745_p7 = scmp.ne.s32.totalorder %s4205_s3, %s3744_s4  ;;  %p3748_p8 = scmp.lt.u32.totalorder %s3744_s4, %s4205_s3 }
 0x6bd   :  { %p3750_p9 = pnand %p3748_p8, %p3745_p7 }
 0x6bf   :  { %3753 = shalt.err (!%p3750_p9)
}
 0x6c0   :  { %2792 = dma.vmem_to_hbm [thread:$0]  %s2787_s27, 512, %s4205_s3, [#allocation6], %s3761_s22, %s3761_s22, %s3762_s23  }
 0x6c1   :  { %3758 = dma.done.wait [#allocation6], 512  }
 0x6c2   :  { %3759 = vsyncadd [#allocation6], 4294966784 }
 0x6c3   :  { %2796 = vsyncpa [#allocation5], 1 }
 0x6c4   :  { %2797 = vsyncpa [#allocation8], 1 }
 0x6c5   :  { %2798 = vsyncpa [#allocation6], 1 }

</bundles_post_ra>
